<compile_context>
chip_gen: v7x
topology: tpu7x:2x2x1
jax: 0.10.0
libtpu: 0.0.40
codegen_flags: <defaults>
</compile_context>

<pallas_src>
import jax
import jax.numpy as jnp
from jax.experimental import pallas as pl
from jax.experimental.pallas import tpu as pltpu


def _round_up(v, m):
    return ((v + m - 1) // m) * m


_UNROLL_FULL_MAX_T = 32          # fully unroll the time loop up to this block size
_DEFAULT_VMEM_BUDGET = 40 << 20  # conservative: fits v7x (64 MiB/TC), v6e, raised v5e


def gru_kernel(gi_ref, h0_ref, wh_ref, bhn_ref, out_ref, h_scratch):
    """One batch-block x time-block step of the GRU recurrence.

    gi_ref : (T, Bb, 3*Hp) bf16/f32  -- precomputed x@W_ih^T + folded biases (r|z|n)
    h0_ref : (1, Bb, Hp)   f32       -- initial hidden state
    wh_ref : (Hp, 3*Hp)    bf16/f32  -- fused recurrent weights [W_hr^T|W_hz^T|W_hn^T]
    bhn_ref: (1, Hp)       f32       -- b_hn (applied inside the reset gate)
    out_ref: (T, Bb, Hp)             -- per-timestep hidden states
    h_scratch: (Bb, Hp)    f32       -- carried hidden state across time blocks
    """
    s = pl.program_id(1)

    # (Re)initialize the carried hidden state at the start of every sequence
    # (s == 0 also fires at the start of each batch block).
    @pl.when(s == 0)
    def _():
        h_scratch[...] = h0_ref[0].astype(jnp.float32)

    T = out_ref.shape[0]              # static time-block length
    Hp = out_ref.shape[2]             # static (multiple of 128 -> lane-aligned slices)
    w_all = wh_ref[...]               # (Hp, 3*Hp), hoisted out of the loop
    b_hn = bhn_ref[...]               # (1, Hp) f32

    def step(t, h):
        # One fused MXU matmul per step: gh = h @ [W_hr^T | W_hz^T | W_hn^T].
        gh = jnp.dot(h.astype(w_all.dtype), w_all,
                     preferred_element_type=jnp.float32)          # (Bb, 3*Hp) f32
        gi = gi_ref[t].astype(jnp.float32)                        # (Bb, 3*Hp) f32
        # gi already contains b_ih (+ b_hr/b_hz folded in); b_hn stays here
        # because PyTorch gates it by r: n = tanh(W_in x + b_in + r*(W_hn h + b_hn)).
        r = jax.nn.sigmoid(gi[:, :Hp] + gh[:, :Hp])
        z = jax.nn.sigmoid(gi[:, Hp:2 * Hp] + gh[:, Hp:2 * Hp])
        n = jnp.tanh(gi[:, 2 * Hp:] + r * (gh[:, 2 * Hp:] + b_hn))
        h_new = (1.0 - z) * n + z * h
        out_ref[t] = h_new.astype(out_ref.dtype)
        return h_new

    h = h_scratch[...]                # (Bb, Hp) f32 carried state
    if T <= _UNROLL_FULL_MAX_T:
        # Short fixed trip count: straight-line code, full LLO visibility.
        for t in range(T):
            h = step(t, h)
    else:
        # Long time blocks: bounded code size / live ranges, modest unroll.
        h = jax.lax.fori_loop(0, T, step, h, unroll=8)

    h_scratch[...] = h


def _choose_time_block(S, Bb, Hp, gi_isz, out_isz, w_isz, budget_bytes):
    """Largest divisor T of S whose live VMEM estimate fits the budget."""
    fixed = Hp * 3 * Hp * w_isz       # fused recurrent weights (single-buffered)
    fixed += 2 * Bb * Hp * 4          # h0 block (double-buffered, f32)
    fixed += Bb * Hp * 4              # h scratch
    fixed += 2 * Hp * 4               # b_hn
    fixed += 2 << 20                  # compiler-internal slack
    best = 1
    for T in range(1, S + 1):
        if S % T:
            continue
        live = fixed + 2 * T * Bb * (3 * Hp * gi_isz + Hp * out_isz)
        if live <= budget_bytes:
            best = T
    return best


def gru_forward(x, h0, w_ih, w_hh, b_ih, b_hh, *,
                time_block=None, num_batch_blocks=None,
                weight_dtype=jnp.bfloat16, gi_dtype=jnp.bfloat16,
                vmem_budget_bytes=_DEFAULT_VMEM_BUDGET):
    """x: (S,B,I); h0: (1,B,H) or None; w_ih: (3H,I); w_hh: (3H,H); b_*: (3H,).

    For long sequences / accuracy-sensitive use, pass weight_dtype=gi_dtype=float32.
    """
    S, B, I = x.shape
    H = w_hh.shape[1]
    out_dtype = x.dtype

    if h0 is None:
        h0 = jnp.zeros((1, B, H), dtype=jnp.float32)

    # ---- Hardware-tile padding (8 sublanes, 128 lanes). Padded hidden columns stay
    # inert (zero weights / zero biases / zero h0 lanes); padded batch rows evolve
    # independently and are sliced off at the end.
    Bp = _round_up(B, 8)
    Hp = _round_up(H, 128)

    # ---- Hoist the input projection off the serial path: ONE (S*Bp, I) x (I, 3*Hp)
    # matmul producing gi already padded + gate-concatenated (r | z | n at Hp offsets).
    # b_ih plus the r/z parts of b_hh are folded in; b_hn stays in-kernel (gated by r).
    def _pad_wih_gate(w_g):                      # (H, I) -> (I, Hp), transposed
        return jnp.pad(w_g.T, ((0, 0), (0, Hp - H)))

    def _pad_vec(v):                             # (H,) -> (Hp,)
        return jnp.pad(v, (0, Hp - H))

    w_ih_all_t = jnp.concatenate(
        [_pad_wih_gate(w_ih[:H]), _pad_wih_gate(w_ih[H:2 * H]),
         _pad_wih_gate(w_ih[2 * H:])], axis=1).astype(jnp.float32)   # (I, 3*Hp)
    b_fold_all = jnp.concatenate(
        [_pad_vec(b_ih[:H] + b_hh[:H]),
         _pad_vec(b_ih[H:2 * H] + b_hh[H:2 * H]),
         _pad_vec(b_ih[2 * H:])]).astype(jnp.float32)                # (3*Hp,)

    x_p = jnp.pad(x, ((0, 0), (0, Bp - B), (0, 0))).astype(jnp.float32)
    gi = jnp.dot(x_p.reshape(S * Bp, I), w_ih_all_t,
                 precision=jax.lax.Precision.HIGHEST) + b_fold_all
    gi = gi.reshape(S, Bp, 3 * Hp).astype(gi_dtype)   # stored bf16: halves gi HBM traffic

    # ---- Fused gate-major recurrent weights: one (Hp, 3*Hp) tile, pre-transposed for
    # h @ W^T, cast to bf16 for the MXU (f32 accumulation in the kernel).
    def _pad_whh_gate(w_g):                      # (H, H) -> (Hp, Hp), transposed
        return jnp.pad(w_g.T, ((0, Hp - H), (0, Hp - H)))

    w_h_all = jnp.concatenate(
        [_pad_whh_gate(w_hh[:H]), _pad_whh_gate(w_hh[H:2 * H]),
         _pad_whh_gate(w_hh[2 * H:])], axis=1).astype(weight_dtype)  # (Hp, 3*Hp)
    b_hn = _pad_vec(b_hh[2 * H:]).astype(jnp.float32).reshape(1, Hp)

    h0_p = jnp.pad(h0.astype(jnp.float32), ((0, 0), (0, Bp - B), (0, Hp - H)))

    # ---- Grid sizing. Batch blocks: use both v7x TensorCores when Bp allows it.
    if num_batch_blocks is None:
        num_batch_blocks = 2 if Bp >= 16 else 1
    NB = num_batch_blocks
    assert Bp % NB == 0
    Bb = Bp // NB
    assert Bb % 8 == 0

    gi_isz = jnp.dtype(gi_dtype).itemsize
    out_isz = jnp.dtype(out_dtype).itemsize
    w_isz = jnp.dtype(weight_dtype).itemsize
    if time_block is None:
        T = _choose_time_block(S, Bb, Hp, gi_isz, out_isz, w_isz, vmem_budget_bytes)
    else:
        T = time_block
    assert S % T == 0

    live_est = (Hp * 3 * Hp * w_isz                         # fused weights (1 buffer)
                + 2 * T * Bb * (3 * Hp * gi_isz + Hp * out_isz)  # gi + out blocks (2 bufs)
                + 3 * Bb * Hp * 4 + 2 * Hp * 4)             # h0, scratch, b_hn
    vmem_limit = int(min(max(live_est + (4 << 20), 24 << 20), 48 << 20))

    out_p = pl.pallas_call(
        gru_kernel,
        out_shape=jax.ShapeDtypeStruct((S, Bp, Hp), out_dtype),
        grid_spec=pltpu.PrefetchScalarGridSpec(
            num_scalar_prefetch=0,
            grid=(NB, S // T),
            in_specs=[
                # Fused gi (r|z|n): one DMA stream per grid step.
                pl.BlockSpec((T, Bb, 3 * Hp), lambda b, s: (s, b, 0)),
                # Initial hidden state (only read at s == 0).
                pl.BlockSpec((1, Bb, Hp), lambda b, s: (0, b, 0)),
                # Constant-index operands: single-buffered to save VMEM.
                pl.BlockSpec((Hp, 3 * Hp), lambda b, s: (0, 0),
                             pipeline_mode=pl.Buffered(1)),
                pl.BlockSpec((1, Hp), lambda b, s: (0, 0),
                             pipeline_mode=pl.Buffered(1)),
            ],
            out_specs=pl.BlockSpec((T, Bb, Hp), lambda b, s: (s, b, 0)),
            scratch_shapes=[pltpu.VMEM((Bb, Hp), jnp.float32)],
        ),
        compiler_params=pltpu.CompilerParams(
            dimension_semantics=("parallel", "arbitrary"),
            vmem_limit_bytes=vmem_limit,
        ),
    )(gi, h0_p, w_h_all, b_hn)

    out = out_p[:, :B, :H]
    h_n = out[S - 1:S]          # last hidden state == out[-1] for a single-layer GRU
    return out, h_n


def gru_reference(x, h0, w_ih, w_hh, b_ih, b_hh):
    """Pure-JAX f32 reference matching torch.nn.GRU semantics."""
    S, B, I = x.shape
    H = w_hh.shape[1]
    h = h0[0]
    outs = []
    for t in range(S):
        gi = x[t] @ w_ih.T + b_ih
        gh = h @ w_hh.T + b_hh
        i_r, i_z, i_n = gi[:, :H], gi[:, H:2 * H], gi[:, 2 * H:]
        h_r, h_z, h_n = gh[:, :H], gh[:, H:2 * H], gh[:, 2 * H:]
        r = jax.nn.sigmoid(i_r + h_r)
        z = jax.nn.sigmoid(i_z + h_z)
        n = jnp.tanh(i_n + r * h_n)
        h = (1.0 - z) * n + z * h
        outs.append(h)
    return jnp.stack(outs, axis=0), h[None]


if __name__ == "__main__":
    # Small shapes consistent with the module: seq=8, batch=2, input_dim=4, hidden=32.
    S, B, I, H = 8, 2, 4, 32
    key = jax.random.PRNGKey(0)
    k_x, k_wih, k_whh, k_bih, k_bhh = jax.random.split(key, 5)

    scale = 1.0 / jnp.sqrt(H)  # PyTorch-style uniform(-1/sqrt(H), 1/sqrt(H)) init
    x = jax.random.normal(k_x, (S, B, I), dtype=jnp.float32)
    w_ih = jax.random.uniform(k_wih, (3 * H, I), jnp.float32, -scale, scale)
    w_hh = jax.random.uniform(k_whh, (3 * H, H), jnp.float32, -scale, scale)
    b_ih = jax.random.uniform(k_bih, (3 * H,), jnp.float32, -scale, scale)
    b_hh = jax.random.uniform(k_bhh, (3 * H,), jnp.float32, -scale, scale)

    # hidden=None in the PyTorch module -> zeros initial hidden state.
    h0 = jnp.zeros((1, B, H), dtype=jnp.float32)

    out, h_n = jax.jit(gru_forward)(x, h0, w_ih, w_hh, b_ih, b_hh)
    jax.block_until_ready((out, h_n))

    out_ref, h_n_ref = gru_reference(x, h0, w_ih, w_hh, b_ih, b_hh)
    assert out.shape == (S, B, H) and h_n.shape == (1, B, H)
    # bf16 recurrent weights + bf16 gi (f32 accumulation / gate math) -> relaxed tol.
    assert jnp.allclose(out, out_ref, rtol=2e-2, atol=2e-2), \
        float(jnp.max(jnp.abs(out - out_ref)))
    assert jnp.allclose(h_n, h_n_ref, rtol=2e-2, atol=2e-2)

    print("KERNEL_OK")
</pallas_src>

<mosaic_0001>
module attributes {stable_mosaic.version = 11 : i64} {
  func.func @gru_kernel(%arg0: i32, %arg1: i32, %arg2: memref<8x8x384xbf16, #tpu.memory_space<vmem>>, %arg3: memref<1x8x128xf32, #tpu.memory_space<vmem>>, %arg4: memref<128x384xbf16, #tpu.memory_space<vmem>>, %arg5: memref<1x128xf32, #tpu.memory_space<vmem>>, %arg6: memref<8x8x128xf32, #tpu.memory_space<vmem>>, %arg7: memref<8x128xf32, #tpu.memory_space<vmem>>) attributes {dimension_semantics = [#tpu.dimension_semantics<parallel>, #tpu.dimension_semantics<arbitrary>], iteration_bounds = array<i64: 1, 1>, scalar_prefetch = 0 : i64, scratch_operands = 1 : i64, tpu.core_type = #tpu.core_type<tc>, window_params = [{transform_indices = @transform_0, window_bounds = array<i64: 8, 8, 384>}, {transform_indices = @transform_1, window_bounds = array<i64: 1, 8, 128>}, {pipeline_mode = #tpu.pipeline_mode<synchronous>, transform_indices = @transform_2, window_bounds = array<i64: 128, 384>}, {pipeline_mode = #tpu.pipeline_mode<synchronous>, transform_indices = @transform_3, window_bounds = array<i64: 1, 128>}, {transform_indices = @transform_4, window_bounds = array<i64: 8, 8, 128>}]} {
    %c0_i32 = arith.constant 0 : i32
    %0 = arith.cmpi eq, %arg1, %c0_i32 : i32
    %1 = arith.extui %0 : i1 to i32
    %c0_i32_0 = arith.constant 0 : i32
    %2 = arith.cmpi ne, %1, %c0_i32_0 : i32
    scf.if %2 {
      %c0_80 = arith.constant 0 : index
      %c0_81 = arith.constant 0 : index
      %c0_82 = arith.constant 0 : index
      %295 = vector.load %arg3[%c0_80, %c0_81, %c0_82] : memref<1x8x128xf32, #tpu.memory_space<vmem>>, vector<1x8x128xf32>
      %296 = vector.shape_cast %295 : vector<1x8x128xf32> to vector<8x128xf32>
      %c0_83 = arith.constant 0 : index
      %c0_84 = arith.constant 0 : index
      %297 = vector.load %arg7[%c0_83, %c0_84] : memref<8x128xf32, #tpu.memory_space<vmem>>, vector<8x128xf32>
      tpu.vector_store %arg7[%c0_83, %c0_84], %296 {strides = array<i32>} : memref<8x128xf32, #tpu.memory_space<vmem>>, vector<8x128xf32>,
    } else {
    }
    %c0 = arith.constant 0 : index
    %c0_1 = arith.constant 0 : index
    %3 = vector.load %arg4[%c0, %c0_1] : memref<128x384xbf16, #tpu.memory_space<vmem>>, vector<128x384xbf16>
    %c0_2 = arith.constant 0 : index
    %c0_3 = arith.constant 0 : index
    %4 = vector.load %arg5[%c0_2, %c0_3] : memref<1x128xf32, #tpu.memory_space<vmem>>, vector<1x128xf32>
    %c0_4 = arith.constant 0 : index
    %c0_5 = arith.constant 0 : index
    %5 = vector.load %arg7[%c0_4, %c0_5] : memref<8x128xf32, #tpu.memory_space<vmem>>, vector<8x128xf32>
    %6 = arith.truncf %5 : vector<8x128xf32> to vector<8x128xbf16>
    %cst = arith.constant dense<0.000000e+00> : vector<8x384xf32>
    %7 = tpu.matmul %6, %3, %cst {dimension_numbers = #tpu.dot_dimension_numbers<[1], [0], [0], [1], [0, 0, 1, 1], [], []>} : vector<8x128xbf16>, vector<128x384xbf16>, vector<8x384xf32> -> vector<8x384xf32>
    %c0_6 = arith.constant 0 : index
    %c0_7 = arith.constant 0 : index
    %c0_8 = arith.constant 0 : index
    %8 = vector.load %arg2[%c0_6, %c0_7, %c0_8] : memref<8x8x384xbf16, #tpu.memory_space<vmem>>, vector<1x8x384xbf16>
    %9 = vector.shape_cast %8 : vector<1x8x384xbf16> to vector<8x384xbf16>
    %10 = arith.extf %9 : vector<8x384xbf16> to vector<8x384xf32>
    %11 = vector.extract_strided_slice %10 {offsets = [0, 0], sizes = [8, 128], strides = [1, 1]} : vector<8x384xf32> to vector<8x128xf32>
    %12 = vector.extract_strided_slice %7 {offsets = [0, 0], sizes = [8, 128], strides = [1, 1]} : vector<8x384xf32> to vector<8x128xf32>
    %13 = arith.addf %11, %12 : vector<8x128xf32>
    %14 = arith.negf %13 : vector<8x128xf32>
    %15 = math.exp %14 : vector<8x128xf32>
    %cst_9 = arith.constant 1.000000e+00 : f32
    %16 = vector.broadcast %cst_9 : f32 to vector<8x128xf32>
    %17 = arith.addf %16, %15 : vector<8x128xf32>
    %18 = arith.divf %16, %17 : vector<8x128xf32>
    %19 = vector.extract_strided_slice %10 {offsets = [0, 128], sizes = [8, 128], strides = [1, 1]} : vector<8x384xf32> to vector<8x128xf32>
    %20 = vector.extract_strided_slice %7 {offsets = [0, 128], sizes = [8, 128], strides = [1, 1]} : vector<8x384xf32> to vector<8x128xf32>
    %21 = arith.addf %19, %20 : vector<8x128xf32>
    %22 = arith.negf %21 : vector<8x128xf32>
    %23 = math.exp %22 : vector<8x128xf32>
    %cst_10 = arith.constant 1.000000e+00 : f32
    %24 = vector.broadcast %cst_10 : f32 to vector<8x128xf32>
    %25 = arith.addf %24, %23 : vector<8x128xf32>
    %26 = arith.divf %24, %25 : vector<8x128xf32>
    %27 = vector.extract_strided_slice %10 {offsets = [0, 256], sizes = [8, 128], strides = [1, 1]} : vector<8x384xf32> to vector<8x128xf32>
    %28 = vector.extract_strided_slice %7 {offsets = [0, 256], sizes = [8, 128], strides = [1, 1]} : vector<8x384xf32> to vector<8x128xf32>
    %29 = vector.broadcast %4 : vector<1x128xf32> to vector<8x128xf32>
    %30 = arith.addf %28, %29 : vector<8x128xf32>
    %31 = arith.mulf %18, %30 : vector<8x128xf32>
    %32 = arith.addf %27, %31 : vector<8x128xf32>
    %33 = math.tanh %32 : vector<8x128xf32>
    %cst_11 = arith.constant 1.000000e+00 : f32
    %34 = vector.broadcast %cst_11 : f32 to vector<8x128xf32>
    %35 = arith.subf %34, %26 : vector<8x128xf32>
    %36 = arith.mulf %35, %33 : vector<8x128xf32>
    %37 = arith.mulf %26, %5 : vector<8x128xf32>
    %38 = arith.addf %36, %37 : vector<8x128xf32>
    %c0_12 = arith.constant 0 : index
    %c0_13 = arith.constant 0 : index
    %c0_14 = arith.constant 0 : index
    %39 = vector.load %arg6[%c0_12, %c0_13, %c0_14] : memref<8x8x128xf32, #tpu.memory_space<vmem>>, vector<1x8x128xf32>
    %40 = vector.shape_cast %39 : vector<1x8x128xf32> to vector<8x128xf32>
    %41 = vector.shape_cast %38 : vector<8x128xf32> to vector<1x8x128xf32>
    tpu.vector_store %arg6[%c0_12, %c0_13, %c0_14], %41 {strides = array<i32>} : memref<8x8x128xf32, #tpu.memory_space<vmem>>, vector<1x8x128xf32>,
    %42 = arith.truncf %38 : vector<8x128xf32> to vector<8x128xbf16>
    %cst_15 = arith.constant dense<0.000000e+00> : vector<8x384xf32>
    %43 = tpu.matmul %42, %3, %cst_15 {dimension_numbers = #tpu.dot_dimension_numbers<[1], [0], [0], [1], [0, 0, 1, 1], [], []>} : vector<8x128xbf16>, vector<128x384xbf16>, vector<8x384xf32> -> vector<8x384xf32>
    %c1 = arith.constant 1 : index
    %c0_16 = arith.constant 0 : index
    %c0_17 = arith.constant 0 : index
    %44 = vector.load %arg2[%c1, %c0_16, %c0_17] : memref<8x8x384xbf16, #tpu.memory_space<vmem>>, vector<1x8x384xbf16>
    %45 = vector.shape_cast %44 : vector<1x8x384xbf16> to vector<8x384xbf16>
    %46 = arith.extf %45 : vector<8x384xbf16> to vector<8x384xf32>
    %47 = vector.extract_strided_slice %46 {offsets = [0, 0], sizes = [8, 128], strides = [1, 1]} : vector<8x384xf32> to vector<8x128xf32>
    %48 = vector.extract_strided_slice %43 {offsets = [0, 0], sizes = [8, 128], strides = [1, 1]} : vector<8x384xf32> to vector<8x128xf32>
    %49 = arith.addf %47, %48 : vector<8x128xf32>
    %50 = arith.negf %49 : vector<8x128xf32>
    %51 = math.exp %50 : vector<8x128xf32>
    %cst_18 = arith.constant 1.000000e+00 : f32
    %52 = vector.broadcast %cst_18 : f32 to vector<8x128xf32>
    %53 = arith.addf %52, %51 : vector<8x128xf32>
    %54 = arith.divf %52, %53 : vector<8x128xf32>
    %55 = vector.extract_strided_slice %46 {offsets = [0, 128], sizes = [8, 128], strides = [1, 1]} : vector<8x384xf32> to vector<8x128xf32>
    %56 = vector.extract_strided_slice %43 {offsets = [0, 128], sizes = [8, 128], strides = [1, 1]} : vector<8x384xf32> to vector<8x128xf32>
    %57 = arith.addf %55, %56 : vector<8x128xf32>
    %58 = arith.negf %57 : vector<8x128xf32>
    %59 = math.exp %58 : vector<8x128xf32>
    %cst_19 = arith.constant 1.000000e+00 : f32
    %60 = vector.broadcast %cst_19 : f32 to vector<8x128xf32>
    %61 = arith.addf %60, %59 : vector<8x128xf32>
    %62 = arith.divf %60, %61 : vector<8x128xf32>
    %63 = vector.extract_strided_slice %46 {offsets = [0, 256], sizes = [8, 128], strides = [1, 1]} : vector<8x384xf32> to vector<8x128xf32>
    %64 = vector.extract_strided_slice %43 {offsets = [0, 256], sizes = [8, 128], strides = [1, 1]} : vector<8x384xf32> to vector<8x128xf32>
    %65 = vector.broadcast %4 : vector<1x128xf32> to vector<8x128xf32>
    %66 = arith.addf %64, %65 : vector<8x128xf32>
    %67 = arith.mulf %54, %66 : vector<8x128xf32>
    %68 = arith.addf %63, %67 : vector<8x128xf32>
    %69 = math.tanh %68 : vector<8x128xf32>
    %cst_20 = arith.constant 1.000000e+00 : f32
    %70 = vector.broadcast %cst_20 : f32 to vector<8x128xf32>
    %71 = arith.subf %70, %62 : vector<8x128xf32>
    %72 = arith.mulf %71, %69 : vector<8x128xf32>
    %73 = arith.mulf %62, %38 : vector<8x128xf32>
    %74 = arith.addf %72, %73 : vector<8x128xf32>
    %c1_21 = arith.constant 1 : index
    %c0_22 = arith.constant 0 : index
    %c0_23 = arith.constant 0 : index
    %75 = vector.load %arg6[%c1_21, %c0_22, %c0_23] : memref<8x8x128xf32, #tpu.memory_space<vmem>>, vector<1x8x128xf32>
    %76 = vector.shape_cast %75 : vector<1x8x128xf32> to vector<8x128xf32>
    %77 = vector.shape_cast %74 : vector<8x128xf32> to vector<1x8x128xf32>
    tpu.vector_store %arg6[%c1_21, %c0_22, %c0_23], %77 {strides = array<i32>} : memref<8x8x128xf32, #tpu.memory_space<vmem>>, vector<1x8x128xf32>,
    %78 = arith.truncf %74 : vector<8x128xf32> to vector<8x128xbf16>
    %cst_24 = arith.constant dense<0.000000e+00> : vector<8x384xf32>
    %79 = tpu.matmul %78, %3, %cst_24 {dimension_numbers = #tpu.dot_dimension_numbers<[1], [0], [0], [1], [0, 0, 1, 1], [], []>} : vector<8x128xbf16>, vector<128x384xbf16>, vector<8x384xf32> -> vector<8x384xf32>
    %c2 = arith.constant 2 : index
    %c0_25 = arith.constant 0 : index
    %c0_26 = arith.constant 0 : index
    %80 = vector.load %arg2[%c2, %c0_25, %c0_26] : memref<8x8x384xbf16, #tpu.memory_space<vmem>>, vector<1x8x384xbf16>
    %81 = vector.shape_cast %80 : vector<1x8x384xbf16> to vector<8x384xbf16>
    %82 = arith.extf %81 : vector<8x384xbf16> to vector<8x384xf32>
    %83 = vector.extract_strided_slice %82 {offsets = [0, 0], sizes = [8, 128], strides = [1, 1]} : vector<8x384xf32> to vector<8x128xf32>
    %84 = vector.extract_strided_slice %79 {offsets = [0, 0], sizes = [8, 128], strides = [1, 1]} : vector<8x384xf32> to vector<8x128xf32>
    %85 = arith.addf %83, %84 : vector<8x128xf32>
    %86 = arith.negf %85 : vector<8x128xf32>
    %87 = math.exp %86 : vector<8x128xf32>
    %cst_27 = arith.constant 1.000000e+00 : f32
    %88 = vector.broadcast %cst_27 : f32 to vector<8x128xf32>
    %89 = arith.addf %88, %87 : vector<8x128xf32>
    %90 = arith.divf %88, %89 : vector<8x128xf32>
    %91 = vector.extract_strided_slice %82 {offsets = [0, 128], sizes = [8, 128], strides = [1, 1]} : vector<8x384xf32> to vector<8x128xf32>
    %92 = vector.extract_strided_slice %79 {offsets = [0, 128], sizes = [8, 128], strides = [1, 1]} : vector<8x384xf32> to vector<8x128xf32>
    %93 = arith.addf %91, %92 : vector<8x128xf32>
    %94 = arith.negf %93 : vector<8x128xf32>
    %95 = math.exp %94 : vector<8x128xf32>
    %cst_28 = arith.constant 1.000000e+00 : f32
    %96 = vector.broadcast %cst_28 : f32 to vector<8x128xf32>
    %97 = arith.addf %96, %95 : vector<8x128xf32>
    %98 = arith.divf %96, %97 : vector<8x128xf32>
    %99 = vector.extract_strided_slice %82 {offsets = [0, 256], sizes = [8, 128], strides = [1, 1]} : vector<8x384xf32> to vector<8x128xf32>
    %100 = vector.extract_strided_slice %79 {offsets = [0, 256], sizes = [8, 128], strides = [1, 1]} : vector<8x384xf32> to vector<8x128xf32>
    %101 = vector.broadcast %4 : vector<1x128xf32> to vector<8x128xf32>
    %102 = arith.addf %100, %101 : vector<8x128xf32>
    %103 = arith.mulf %90, %102 : vector<8x128xf32>
    %104 = arith.addf %99, %103 : vector<8x128xf32>
    %105 = math.tanh %104 : vector<8x128xf32>
    %cst_29 = arith.constant 1.000000e+00 : f32
    %106 = vector.broadcast %cst_29 : f32 to vector<8x128xf32>
    %107 = arith.subf %106, %98 : vector<8x128xf32>
    %108 = arith.mulf %107, %105 : vector<8x128xf32>
    %109 = arith.mulf %98, %74 : vector<8x128xf32>
    %110 = arith.addf %108, %109 : vector<8x128xf32>
    %c2_30 = arith.constant 2 : index
    %c0_31 = arith.constant 0 : index
    %c0_32 = arith.constant 0 : index
    %111 = vector.load %arg6[%c2_30, %c0_31, %c0_32] : memref<8x8x128xf32, #tpu.memory_space<vmem>>, vector<1x8x128xf32>
    %112 = vector.shape_cast %111 : vector<1x8x128xf32> to vector<8x128xf32>
    %113 = vector.shape_cast %110 : vector<8x128xf32> to vector<1x8x128xf32>
    tpu.vector_store %arg6[%c2_30, %c0_31, %c0_32], %113 {strides = array<i32>} : memref<8x8x128xf32, #tpu.memory_space<vmem>>, vector<1x8x128xf32>,
    %114 = arith.truncf %110 : vector<8x128xf32> to vector<8x128xbf16>
    %cst_33 = arith.constant dense<0.000000e+00> : vector<8x384xf32>
    %115 = tpu.matmul %114, %3, %cst_33 {dimension_numbers = #tpu.dot_dimension_numbers<[1], [0], [0], [1], [0, 0, 1, 1], [], []>} : vector<8x128xbf16>, vector<128x384xbf16>, vector<8x384xf32> -> vector<8x384xf32>
    %c3 = arith.constant 3 : index
    %c0_34 = arith.constant 0 : index
    %c0_35 = arith.constant 0 : index
    %116 = vector.load %arg2[%c3, %c0_34, %c0_35] : memref<8x8x384xbf16, #tpu.memory_space<vmem>>, vector<1x8x384xbf16>
    %117 = vector.shape_cast %116 : vector<1x8x384xbf16> to vector<8x384xbf16>
    %118 = arith.extf %117 : vector<8x384xbf16> to vector<8x384xf32>
    %119 = vector.extract_strided_slice %118 {offsets = [0, 0], sizes = [8, 128], strides = [1, 1]} : vector<8x384xf32> to vector<8x128xf32>
    %120 = vector.extract_strided_slice %115 {offsets = [0, 0], sizes = [8, 128], strides = [1, 1]} : vector<8x384xf32> to vector<8x128xf32>
    %121 = arith.addf %119, %120 : vector<8x128xf32>
    %122 = arith.negf %121 : vector<8x128xf32>
    %123 = math.exp %122 : vector<8x128xf32>
    %cst_36 = arith.constant 1.000000e+00 : f32
    %124 = vector.broadcast %cst_36 : f32 to vector<8x128xf32>
    %125 = arith.addf %124, %123 : vector<8x128xf32>
    %126 = arith.divf %124, %125 : vector<8x128xf32>
    %127 = vector.extract_strided_slice %118 {offsets = [0, 128], sizes = [8, 128], strides = [1, 1]} : vector<8x384xf32> to vector<8x128xf32>
    %128 = vector.extract_strided_slice %115 {offsets = [0, 128], sizes = [8, 128], strides = [1, 1]} : vector<8x384xf32> to vector<8x128xf32>
    %129 = arith.addf %127, %128 : vector<8x128xf32>
    %130 = arith.negf %129 : vector<8x128xf32>
    %131 = math.exp %130 : vector<8x128xf32>
    %cst_37 = arith.constant 1.000000e+00 : f32
    %132 = vector.broadcast %cst_37 : f32 to vector<8x128xf32>
    %133 = arith.addf %132, %131 : vector<8x128xf32>
    %134 = arith.divf %132, %133 : vector<8x128xf32>
    %135 = vector.extract_strided_slice %118 {offsets = [0, 256], sizes = [8, 128], strides = [1, 1]} : vector<8x384xf32> to vector<8x128xf32>
    %136 = vector.extract_strided_slice %115 {offsets = [0, 256], sizes = [8, 128], strides = [1, 1]} : vector<8x384xf32> to vector<8x128xf32>
    %137 = vector.broadcast %4 : vector<1x128xf32> to vector<8x128xf32>
    %138 = arith.addf %136, %137 : vector<8x128xf32>
    %139 = arith.mulf %126, %138 : vector<8x128xf32>
    %140 = arith.addf %135, %139 : vector<8x128xf32>
    %141 = math.tanh %140 : vector<8x128xf32>
    %cst_38 = arith.constant 1.000000e+00 : f32
    %142 = vector.broadcast %cst_38 : f32 to vector<8x128xf32>
    %143 = arith.subf %142, %134 : vector<8x128xf32>
    %144 = arith.mulf %143, %141 : vector<8x128xf32>
    %145 = arith.mulf %134, %110 : vector<8x128xf32>
    %146 = arith.addf %144, %145 : vector<8x128xf32>
    %c3_39 = arith.constant 3 : index
    %c0_40 = arith.constant 0 : index
    %c0_41 = arith.constant 0 : index
    %147 = vector.load %arg6[%c3_39, %c0_40, %c0_41] : memref<8x8x128xf32, #tpu.memory_space<vmem>>, vector<1x8x128xf32>
    %148 = vector.shape_cast %147 : vector<1x8x128xf32> to vector<8x128xf32>
    %149 = vector.shape_cast %146 : vector<8x128xf32> to vector<1x8x128xf32>
    tpu.vector_store %arg6[%c3_39, %c0_40, %c0_41], %149 {strides = array<i32>} : memref<8x8x128xf32, #tpu.memory_space<vmem>>, vector<1x8x128xf32>,
    %150 = arith.truncf %146 : vector<8x128xf32> to vector<8x128xbf16>
    %cst_42 = arith.constant dense<0.000000e+00> : vector<8x384xf32>
    %151 = tpu.matmul %150, %3, %cst_42 {dimension_numbers = #tpu.dot_dimension_numbers<[1], [0], [0], [1], [0, 0, 1, 1], [], []>} : vector<8x128xbf16>, vector<128x384xbf16>, vector<8x384xf32> -> vector<8x384xf32>
    %c4 = arith.constant 4 : index
    %c0_43 = arith.constant 0 : index
    %c0_44 = arith.constant 0 : index
    %152 = vector.load %arg2[%c4, %c0_43, %c0_44] : memref<8x8x384xbf16, #tpu.memory_space<vmem>>, vector<1x8x384xbf16>
    %153 = vector.shape_cast %152 : vector<1x8x384xbf16> to vector<8x384xbf16>
    %154 = arith.extf %153 : vector<8x384xbf16> to vector<8x384xf32>
    %155 = vector.extract_strided_slice %154 {offsets = [0, 0], sizes = [8, 128], strides = [1, 1]} : vector<8x384xf32> to vector<8x128xf32>
    %156 = vector.extract_strided_slice %151 {offsets = [0, 0], sizes = [8, 128], strides = [1, 1]} : vector<8x384xf32> to vector<8x128xf32>
    %157 = arith.addf %155, %156 : vector<8x128xf32>
    %158 = arith.negf %157 : vector<8x128xf32>
    %159 = math.exp %158 : vector<8x128xf32>
    %cst_45 = arith.constant 1.000000e+00 : f32
    %160 = vector.broadcast %cst_45 : f32 to vector<8x128xf32>
    %161 = arith.addf %160, %159 : vector<8x128xf32>
    %162 = arith.divf %160, %161 : vector<8x128xf32>
    %163 = vector.extract_strided_slice %154 {offsets = [0, 128], sizes = [8, 128], strides = [1, 1]} : vector<8x384xf32> to vector<8x128xf32>
    %164 = vector.extract_strided_slice %151 {offsets = [0, 128], sizes = [8, 128], strides = [1, 1]} : vector<8x384xf32> to vector<8x128xf32>
    %165 = arith.addf %163, %164 : vector<8x128xf32>
    %166 = arith.negf %165 : vector<8x128xf32>
    %167 = math.exp %166 : vector<8x128xf32>
    %cst_46 = arith.constant 1.000000e+00 : f32
    %168 = vector.broadcast %cst_46 : f32 to vector<8x128xf32>
    %169 = arith.addf %168, %167 : vector<8x128xf32>
    %170 = arith.divf %168, %169 : vector<8x128xf32>
    %171 = vector.extract_strided_slice %154 {offsets = [0, 256], sizes = [8, 128], strides = [1, 1]} : vector<8x384xf32> to vector<8x128xf32>
    %172 = vector.extract_strided_slice %151 {offsets = [0, 256], sizes = [8, 128], strides = [1, 1]} : vector<8x384xf32> to vector<8x128xf32>
    %173 = vector.broadcast %4 : vector<1x128xf32> to vector<8x128xf32>
    %174 = arith.addf %172, %173 : vector<8x128xf32>
    %175 = arith.mulf %162, %174 : vector<8x128xf32>
    %176 = arith.addf %171, %175 : vector<8x128xf32>
    %177 = math.tanh %176 : vector<8x128xf32>
    %cst_47 = arith.constant 1.000000e+00 : f32
    %178 = vector.broadcast %cst_47 : f32 to vector<8x128xf32>
    %179 = arith.subf %178, %170 : vector<8x128xf32>
    %180 = arith.mulf %179, %177 : vector<8x128xf32>
    %181 = arith.mulf %170, %146 : vector<8x128xf32>
    %182 = arith.addf %180, %181 : vector<8x128xf32>
    %c4_48 = arith.constant 4 : index
    %c0_49 = arith.constant 0 : index
    %c0_50 = arith.constant 0 : index
    %183 = vector.load %arg6[%c4_48, %c0_49, %c0_50] : memref<8x8x128xf32, #tpu.memory_space<vmem>>, vector<1x8x128xf32>
    %184 = vector.shape_cast %183 : vector<1x8x128xf32> to vector<8x128xf32>
    %185 = vector.shape_cast %182 : vector<8x128xf32> to vector<1x8x128xf32>
    tpu.vector_store %arg6[%c4_48, %c0_49, %c0_50], %185 {strides = array<i32>} : memref<8x8x128xf32, #tpu.memory_space<vmem>>, vector<1x8x128xf32>,
    %186 = arith.truncf %182 : vector<8x128xf32> to vector<8x128xbf16>
    %cst_51 = arith.constant dense<0.000000e+00> : vector<8x384xf32>
    %187 = tpu.matmul %186, %3, %cst_51 {dimension_numbers = #tpu.dot_dimension_numbers<[1], [0], [0], [1], [0, 0, 1, 1], [], []>} : vector<8x128xbf16>, vector<128x384xbf16>, vector<8x384xf32> -> vector<8x384xf32>
    %c5 = arith.constant 5 : index
    %c0_52 = arith.constant 0 : index
    %c0_53 = arith.constant 0 : index
    %188 = vector.load %arg2[%c5, %c0_52, %c0_53] : memref<8x8x384xbf16, #tpu.memory_space<vmem>>, vector<1x8x384xbf16>
    %189 = vector.shape_cast %188 : vector<1x8x384xbf16> to vector<8x384xbf16>
    %190 = arith.extf %189 : vector<8x384xbf16> to vector<8x384xf32>
    %191 = vector.extract_strided_slice %190 {offsets = [0, 0], sizes = [8, 128], strides = [1, 1]} : vector<8x384xf32> to vector<8x128xf32>
    %192 = vector.extract_strided_slice %187 {offsets = [0, 0], sizes = [8, 128], strides = [1, 1]} : vector<8x384xf32> to vector<8x128xf32>
    %193 = arith.addf %191, %192 : vector<8x128xf32>
    %194 = arith.negf %193 : vector<8x128xf32>
    %195 = math.exp %194 : vector<8x128xf32>
    %cst_54 = arith.constant 1.000000e+00 : f32
    %196 = vector.broadcast %cst_54 : f32 to vector<8x128xf32>
    %197 = arith.addf %196, %195 : vector<8x128xf32>
    %198 = arith.divf %196, %197 : vector<8x128xf32>
    %199 = vector.extract_strided_slice %190 {offsets = [0, 128], sizes = [8, 128], strides = [1, 1]} : vector<8x384xf32> to vector<8x128xf32>
    %200 = vector.extract_strided_slice %187 {offsets = [0, 128], sizes = [8, 128], strides = [1, 1]} : vector<8x384xf32> to vector<8x128xf32>
    %201 = arith.addf %199, %200 : vector<8x128xf32>
    %202 = arith.negf %201 : vector<8x128xf32>
    %203 = math.exp %202 : vector<8x128xf32>
    %cst_55 = arith.constant 1.000000e+00 : f32
    %204 = vector.broadcast %cst_55 : f32 to vector<8x128xf32>
    %205 = arith.addf %204, %203 : vector<8x128xf32>
    %206 = arith.divf %204, %205 : vector<8x128xf32>
    %207 = vector.extract_strided_slice %190 {offsets = [0, 256], sizes = [8, 128], strides = [1, 1]} : vector<8x384xf32> to vector<8x128xf32>
    %208 = vector.extract_strided_slice %187 {offsets = [0, 256], sizes = [8, 128], strides = [1, 1]} : vector<8x384xf32> to vector<8x128xf32>
    %209 = vector.broadcast %4 : vector<1x128xf32> to vector<8x128xf32>
    %210 = arith.addf %208, %209 : vector<8x128xf32>
    %211 = arith.mulf %198, %210 : vector<8x128xf32>
    %212 = arith.addf %207, %211 : vector<8x128xf32>
    %213 = math.tanh %212 : vector<8x128xf32>
    %cst_56 = arith.constant 1.000000e+00 : f32
    %214 = vector.broadcast %cst_56 : f32 to vector<8x128xf32>
    %215 = arith.subf %214, %206 : vector<8x128xf32>
    %216 = arith.mulf %215, %213 : vector<8x128xf32>
    %217 = arith.mulf %206, %182 : vector<8x128xf32>
    %218 = arith.addf %216, %217 : vector<8x128xf32>
    %c5_57 = arith.constant 5 : index
    %c0_58 = arith.constant 0 : index
    %c0_59 = arith.constant 0 : index
    %219 = vector.load %arg6[%c5_57, %c0_58, %c0_59] : memref<8x8x128xf32, #tpu.memory_space<vmem>>, vector<1x8x128xf32>
    %220 = vector.shape_cast %219 : vector<1x8x128xf32> to vector<8x128xf32>
    %221 = vector.shape_cast %218 : vector<8x128xf32> to vector<1x8x128xf32>
    tpu.vector_store %arg6[%c5_57, %c0_58, %c0_59], %221 {strides = array<i32>} : memref<8x8x128xf32, #tpu.memory_space<vmem>>, vector<1x8x128xf32>,
    %222 = arith.truncf %218 : vector<8x128xf32> to vector<8x128xbf16>
    %cst_60 = arith.constant dense<0.000000e+00> : vector<8x384xf32>
    %223 = tpu.matmul %222, %3, %cst_60 {dimension_numbers = #tpu.dot_dimension_numbers<[1], [0], [0], [1], [0, 0, 1, 1], [], []>} : vector<8x128xbf16>, vector<128x384xbf16>, vector<8x384xf32> -> vector<8x384xf32>
    %c6 = arith.constant 6 : index
    %c0_61 = arith.constant 0 : index
    %c0_62 = arith.constant 0 : index
    %224 = vector.load %arg2[%c6, %c0_61, %c0_62] : memref<8x8x384xbf16, #tpu.memory_space<vmem>>, vector<1x8x384xbf16>
    %225 = vector.shape_cast %224 : vector<1x8x384xbf16> to vector<8x384xbf16>
    %226 = arith.extf %225 : vector<8x384xbf16> to vector<8x384xf32>
    %227 = vector.extract_strided_slice %226 {offsets = [0, 0], sizes = [8, 128], strides = [1, 1]} : vector<8x384xf32> to vector<8x128xf32>
    %228 = vector.extract_strided_slice %223 {offsets = [0, 0], sizes = [8, 128], strides = [1, 1]} : vector<8x384xf32> to vector<8x128xf32>
    %229 = arith.addf %227, %228 : vector<8x128xf32>
    %230 = arith.negf %229 : vector<8x128xf32>
    %231 = math.exp %230 : vector<8x128xf32>
    %cst_63 = arith.constant 1.000000e+00 : f32
    %232 = vector.broadcast %cst_63 : f32 to vector<8x128xf32>
    %233 = arith.addf %232, %231 : vector<8x128xf32>
    %234 = arith.divf %232, %233 : vector<8x128xf32>
    %235 = vector.extract_strided_slice %226 {offsets = [0, 128], sizes = [8, 128], strides = [1, 1]} : vector<8x384xf32> to vector<8x128xf32>
    %236 = vector.extract_strided_slice %223 {offsets = [0, 128], sizes = [8, 128], strides = [1, 1]} : vector<8x384xf32> to vector<8x128xf32>
    %237 = arith.addf %235, %236 : vector<8x128xf32>
    %238 = arith.negf %237 : vector<8x128xf32>
    %239 = math.exp %238 : vector<8x128xf32>
    %cst_64 = arith.constant 1.000000e+00 : f32
    %240 = vector.broadcast %cst_64 : f32 to vector<8x128xf32>
    %241 = arith.addf %240, %239 : vector<8x128xf32>
    %242 = arith.divf %240, %241 : vector<8x128xf32>
    %243 = vector.extract_strided_slice %226 {offsets = [0, 256], sizes = [8, 128], strides = [1, 1]} : vector<8x384xf32> to vector<8x128xf32>
    %244 = vector.extract_strided_slice %223 {offsets = [0, 256], sizes = [8, 128], strides = [1, 1]} : vector<8x384xf32> to vector<8x128xf32>
    %245 = vector.broadcast %4 : vector<1x128xf32> to vector<8x128xf32>
    %246 = arith.addf %244, %245 : vector<8x128xf32>
    %247 = arith.mulf %234, %246 : vector<8x128xf32>
    %248 = arith.addf %243, %247 : vector<8x128xf32>
    %249 = math.tanh %248 : vector<8x128xf32>
    %cst_65 = arith.constant 1.000000e+00 : f32
    %250 = vector.broadcast %cst_65 : f32 to vector<8x128xf32>
    %251 = arith.subf %250, %242 : vector<8x128xf32>
    %252 = arith.mulf %251, %249 : vector<8x128xf32>
    %253 = arith.mulf %242, %218 : vector<8x128xf32>
    %254 = arith.addf %252, %253 : vector<8x128xf32>
    %c6_66 = arith.constant 6 : index
    %c0_67 = arith.constant 0 : index
    %c0_68 = arith.constant 0 : index
    %255 = vector.load %arg6[%c6_66, %c0_67, %c0_68] : memref<8x8x128xf32, #tpu.memory_space<vmem>>, vector<1x8x128xf32>
    %256 = vector.shape_cast %255 : vector<1x8x128xf32> to vector<8x128xf32>
    %257 = vector.shape_cast %254 : vector<8x128xf32> to vector<1x8x128xf32>
    tpu.vector_store %arg6[%c6_66, %c0_67, %c0_68], %257 {strides = array<i32>} : memref<8x8x128xf32, #tpu.memory_space<vmem>>, vector<1x8x128xf32>,
    %258 = arith.truncf %254 : vector<8x128xf32> to vector<8x128xbf16>
    %cst_69 = arith.constant dense<0.000000e+00> : vector<8x384xf32>
    %259 = tpu.matmul %258, %3, %cst_69 {dimension_numbers = #tpu.dot_dimension_numbers<[1], [0], [0], [1], [0, 0, 1, 1], [], []>} : vector<8x128xbf16>, vector<128x384xbf16>, vector<8x384xf32> -> vector<8x384xf32>
    %c7 = arith.constant 7 : index
    %c0_70 = arith.constant 0 : index
    %c0_71 = arith.constant 0 : index
    %260 = vector.load %arg2[%c7, %c0_70, %c0_71] : memref<8x8x384xbf16, #tpu.memory_space<vmem>>, vector<1x8x384xbf16>
    %261 = vector.shape_cast %260 : vector<1x8x384xbf16> to vector<8x384xbf16>
    %262 = arith.extf %261 : vector<8x384xbf16> to vector<8x384xf32>
    %263 = vector.extract_strided_slice %262 {offsets = [0, 0], sizes = [8, 128], strides = [1, 1]} : vector<8x384xf32> to vector<8x128xf32>
    %264 = vector.extract_strided_slice %259 {offsets = [0, 0], sizes = [8, 128], strides = [1, 1]} : vector<8x384xf32> to vector<8x128xf32>
    %265 = arith.addf %263, %264 : vector<8x128xf32>
    %266 = arith.negf %265 : vector<8x128xf32>
    %267 = math.exp %266 : vector<8x128xf32>
    %cst_72 = arith.constant 1.000000e+00 : f32
    %268 = vector.broadcast %cst_72 : f32 to vector<8x128xf32>
    %269 = arith.addf %268, %267 : vector<8x128xf32>
    %270 = arith.divf %268, %269 : vector<8x128xf32>
    %271 = vector.extract_strided_slice %262 {offsets = [0, 128], sizes = [8, 128], strides = [1, 1]} : vector<8x384xf32> to vector<8x128xf32>
    %272 = vector.extract_strided_slice %259 {offsets = [0, 128], sizes = [8, 128], strides = [1, 1]} : vector<8x384xf32> to vector<8x128xf32>
    %273 = arith.addf %271, %272 : vector<8x128xf32>
    %274 = arith.negf %273 : vector<8x128xf32>
    %275 = math.exp %274 : vector<8x128xf32>
    %cst_73 = arith.constant 1.000000e+00 : f32
    %276 = vector.broadcast %cst_73 : f32 to vector<8x128xf32>
    %277 = arith.addf %276, %275 : vector<8x128xf32>
    %278 = arith.divf %276, %277 : vector<8x128xf32>
    %279 = vector.extract_strided_slice %262 {offsets = [0, 256], sizes = [8, 128], strides = [1, 1]} : vector<8x384xf32> to vector<8x128xf32>
    %280 = vector.extract_strided_slice %259 {offsets = [0, 256], sizes = [8, 128], strides = [1, 1]} : vector<8x384xf32> to vector<8x128xf32>
    %281 = vector.broadcast %4 : vector<1x128xf32> to vector<8x128xf32>
    %282 = arith.addf %280, %281 : vector<8x128xf32>
    %283 = arith.mulf %270, %282 : vector<8x128xf32>
    %284 = arith.addf %279, %283 : vector<8x128xf32>
    %285 = math.tanh %284 : vector<8x128xf32>
    %cst_74 = arith.constant 1.000000e+00 : f32
    %286 = vector.broadcast %cst_74 : f32 to vector<8x128xf32>
    %287 = arith.subf %286, %278 : vector<8x128xf32>
    %288 = arith.mulf %287, %285 : vector<8x128xf32>
    %289 = arith.mulf %278, %254 : vector<8x128xf32>
    %290 = arith.addf %288, %289 : vector<8x128xf32>
    %c7_75 = arith.constant 7 : index
    %c0_76 = arith.constant 0 : index
    %c0_77 = arith.constant 0 : index
    %291 = vector.load %arg6[%c7_75, %c0_76, %c0_77] : memref<8x8x128xf32, #tpu.memory_space<vmem>>, vector<1x8x128xf32>
    %292 = vector.shape_cast %291 : vector<1x8x128xf32> to vector<8x128xf32>
    %293 = vector.shape_cast %290 : vector<8x128xf32> to vector<1x8x128xf32>
    tpu.vector_store %arg6[%c7_75, %c0_76, %c0_77], %293 {strides = array<i32>} : memref<8x8x128xf32, #tpu.memory_space<vmem>>, vector<1x8x128xf32>,
    %c0_78 = arith.constant 0 : index
    %c0_79 = arith.constant 0 : index
    %294 = vector.load %arg7[%c0_78, %c0_79] : memref<8x128xf32, #tpu.memory_space<vmem>>, vector<8x128xf32>
    tpu.vector_store %arg7[%c0_78, %c0_79], %290 {strides = array<i32>} : memref<8x128xf32, #tpu.memory_space<vmem>>, vector<8x128xf32>,
    return
  }
  func.func @transform_0(%arg0: i32, %arg1: i32) -> (i32, i32, i32) {
    %c0_i32 = arith.constant 0 : i32
    %c0_i32_0 = arith.constant 0 : i32
    return %arg1, %arg0, %c0_i32 : i32, i32, i32
  }
  func.func @transform_1(%arg0: i32, %arg1: i32) -> (i32, i32, i32) {
    %c0_i32 = arith.constant 0 : i32
    %c0_i32_0 = arith.constant 0 : i32
    %c0_i32_1 = arith.constant 0 : i32
    return %c0_i32, %arg0, %c0_i32_0 : i32, i32, i32
  }
  func.func @transform_2(%arg0: i32, %arg1: i32) -> (i32, i32) {
    %c0_i32 = arith.constant 0 : i32
    %c0_i32_0 = arith.constant 0 : i32
    %c0_i32_1 = arith.constant 0 : i32
    return %c0_i32, %c0_i32_0 : i32, i32
  }
  func.func @transform_3(%arg0: i32, %arg1: i32) -> (i32, i32) {
    %c0_i32 = arith.constant 0 : i32
    %c0_i32_0 = arith.constant 0 : i32
    %c0_i32_1 = arith.constant 0 : i32
    return %c0_i32, %c0_i32_0 : i32, i32
  }
  func.func @transform_4(%arg0: i32, %arg1: i32) -> (i32, i32, i32) {
    %c0_i32 = arith.constant 0 : i32
    %c0_i32_0 = arith.constant 0 : i32
    return %arg1, %arg0, %c0_i32 : i32, i32, i32
  }
}

</mosaic_0001>

<bundles_post_ra>
// kernel: gru_forward.1
= control target key start
LH: loop header
LB: loop body
LE: loop exit
PB: predicated region body
PF: predicated region fallthrough
CT: control target
= control target key end

     0   :  { %v1510_v1 = vmov 0.0   ;;  %v1511_v2 = vmov 0   ;;  %vm1512_vm0 = vmmov 0   ;;  %s2090_s2 = inlined_call_operand.vmem [shape: bf16[128,384], index: 2, kind: input, shape index: {}]   ;;  %s2091_s1 = inlined_call_operand.vmem [shape: f32[1,8,128], index: 1, kind: input, shape index: {}]   ;;  %s2092_s0 = inlined_call_operand.vmem [shape: bf16[8,8,384], index: 0, kind: input, shape index: {}]   ;;  %s2093_s3 = inlined_call_operand.vmem [shape: f32[1,128], index: 3, kind: input, shape index: {}]   ;;  %s2094_s4 = inlined_call_operand.vmem [shape: f32[8,8,128], index: 4, kind: output, shape index: {}]  }
   0x1   :  { %v1541_v0 = vld [vmem:[%s2090_s2 + $0x4] ss:$12 sps:$4 sm:$0xff]   ;;  %1225 = vmatprep.subr.bf16.mxu1 %v1510_v1  ;;  %219 = vmatprep.mubr.bf16.mxu0 %v1511_v2  ;;  %v1548_v3 = vld [vmem:[%s2090_s2] ss:$12 sps:$4 sm:$0xff]   ;;  %v1556_v4 = vld [vmem:[%s2090_s2 + $0x1c] ss:$12 sps:$4 sm:$0xff]  }
   0x2   :  { %1241 = vmatprep.mubr.msk.bf16.mxu1 %vm1512_vm0, %v1510_v1  ;;  %187 = vmatprep.subr.bf16.mxu0 %v1541_v0  ;;  %v1562_v5 = vld [vmem:[%s2090_s2 + $0x18] ss:$12 sps:$4 sm:$0xff]   ;;  %v1568_v6 = vld [vmem:[%s2090_s2 + $0x34] ss:$12 sps:$4 sm:$0xff]   ;;  %v1574_v7 = vld [vmem:[%s2090_s2 + $0x30] ss:$12 sps:$4 sm:$0xff]  }
   0x3   :  { %188 = vmatpush1.bf16.msra.mxu0 %v1548_v3  ;;  %v1580_v8 = vld [vmem:[%s2090_s2 + $0x4c] ss:$12 sps:$4 sm:$0xff]   ;;  %v1585_v9 = vld [vmem:[%s2090_s2 + $0x8] ss:$12 sps:$4 sm:$0xff]   ;;  %v1598_v11 = vld [vmem:[%s2090_s2 + $0x64] ss:$12 sps:$4 sm:$0xff]  }
   0x4   :  { %189 = vmatprep.subr.bf16.mxu0 %v1556_v4  ;;  %v1591_v10 = vld [vmem:[%s2090_s2 + $0x48] ss:$12 sps:$4 sm:$0xff]   ;;  %1226 = vmatpush3.bf16.msra.mxu1 %v1585_v9  ;;  %v1604_v12 = vld [vmem:[%s2090_s2 + $0x20] ss:$12 sps:$4 sm:$0xff]   ;;  %v1616_v14 = vld [vmem:[%s2090_s2 + $0x38] ss:$12 sps:$4 sm:$0xff]  }
   0x5   :  { %1227 = vmatprep.subr.bf16.mxu1 %v1510_v1  ;;  %v1609_v13 = vld [vmem:[%s2090_s2 + $0x60] ss:$12 sps:$4 sm:$0xff]   ;;  %v1622_v15 = vld [vmem:[%s2090_s2 + $0x7c] ss:$12 sps:$4 sm:$0xff]   ;;  %v1629_v16 = vld [vmem:[%s2090_s2 + $0x78] ss:$12 sps:$4 sm:$0xff]  }
   0x6   :  { %v1635_v17 = vld [vmem:[%s2090_s2 + $0x50] ss:$12 sps:$4 sm:$0xff]   ;;  %v1641_v18 = vld [vmem:[%s2090_s2 + $0x94] ss:$12 sps:$4 sm:$0xff]   ;;  %v1660_v21 = vld [vmem:[%s2090_s2 + $0xac] ss:$12 sps:$4 sm:$0xff]  }
   0x7   :  { %190 = vmatpush1.bf16.msra.mxu0 %v1562_v5  ;;  %v1648_v19 = vld [vmem:[%s2090_s2 + $0x90] ss:$12 sps:$4 sm:$0xff]   ;;  %v1654_v20 = vld [vmem:[%s2090_s2 + $0x68] ss:$12 sps:$4 sm:$0xff]   ;;  %v1672_v23 = vld [vmem:[%s2091_s1] sm:$0xff] }
   0x8   :  { %191 = vmatprep.subr.bf16.mxu0 %v1568_v6  ;;  %1228 = vmatpush3.bf16.msra.mxu1 %v1604_v12  ;;  %v1667_v22 = vld [vmem:[%s2090_s2 + $0xa8] ss:$12 sps:$4 sm:$0xff]   ;;  %v1678_v24 = vld [vmem:[%s2090_s2 + $0x80] ss:$12 sps:$4 sm:$0xff]   ;;  %v58_v25 = vpack.c.bf16 %v1672_v23, %v1672_v23  ;;  %v1689_v26 = vld [vmem:[%s2090_s2 + $0x98] ss:$12 sps:$4 sm:$0xff]  }
   0x9   :  { %1229 = vmatprep.subr.bf16.mxu1 %v1510_v1  ;;  %v1697_v27 = vld [vmem:[%s2090_s2 + $0xb0] ss:$12 sps:$4 sm:$0xff]   ;;  %v268_v28 = vld [vmem:[%s2092_s0] sm:$0xff]  ;;  %v269_v47 = vld [vmem:[%s2092_s0 + $0x8] sm:$0xf] }
   0xa   :  { %v270_v29 = vunpack.c.l.bf16 %v268_v28  ;;  %v271_v31 = vunpack.c.h.bf16 %v268_v28  ;;  %v1743_v46 = vld [vmem:[%s2093_s3] ss:$0 sm:$0xff]  ;;  %v272_v50 = vunpack.c.l.bf16 %v269_v47  ;;  %v1118_v61 = vld [vmem:[%s2092_s0 + $0xc] sm:$0xff] }
   0xb   :  { %192 = vmatpush1.bf16.msra.mxu0 %v1574_v7  ;;  %v387_v62 = vunpack.c.l.bf16 %v1118_v61 }
   0xc   :  { %193 = vmatprep.subr.bf16.mxu0 %v1580_v8  ;;  %1230 = vmatpush3.bf16.msra.mxu1 %v1616_v14 }
   0xd   :  { %1231 = vmatprep.subr.bf16.mxu1 %v1510_v1 }
   0xf   :  { %194 = vmatpush1.bf16.msra.mxu0 %v1591_v10 }
  0x10   :  { %195 = vmatprep.subr.bf16.mxu0 %v1598_v11  ;;  %1232 = vmatpush3.bf16.msra.mxu1 %v1635_v17 }
  0x11   :  { %1233 = vmatprep.subr.bf16.mxu1 %v1510_v1 }
  0x13   :  { %196 = vmatpush1.bf16.msra.mxu0 %v1609_v13 }
  0x14   :  { %197 = vmatprep.subr.bf16.mxu0 %v1622_v15  ;;  %1234 = vmatpush3.bf16.msra.mxu1 %v1654_v20 }
  0x15   :  { %1235 = vmatprep.subr.bf16.mxu1 %v1510_v1 }
  0x17   :  { %198 = vmatpush1.bf16.msra.mxu0 %v1629_v16 }
  0x18   :  { %199 = vmatprep.subr.bf16.mxu0 %v1641_v18  ;;  %1236 = vmatpush3.bf16.msra.mxu1 %v1678_v24 }
  0x19   :  { %1237 = vmatprep.subr.bf16.mxu1 %v1510_v1 }
  0x1b   :  { %200 = vmatpush1.bf16.msra.mxu0 %v1648_v19 }
  0x1c   :  { %201 = vmatprep.subr.bf16.mxu0 %v1660_v21  ;;  %1238 = vmatpush3.bf16.msra.mxu1 %v1689_v26 }
  0x1d   :  { %1239 = vmatprep.subr.bf16.mxu1 %v1510_v1 }
  0x1f   :  { %202 = vmatpush1.bf16.msra.mxu0 %v1667_v22 }
  0x20   :  { %303 = vmatprep.subr.bf16.mxu0 %v1541_v0  ;;  %1240 = vmatpush3.bf16.msra.mxu1 %v1697_v27 }
  0x21   :  { %1245 = vmatprep.subr.bf16.mxu1 %v1510_v1 }
  0x22   :  { %220 = vmatmul.mubr.bf16.vlgmr.msra.gmra.mrb[0].mxu0 %v58_v25 }
  0x23   :  { %304 = vmatpush1.bf16.msra.mxu0 %v1548_v3  ;;  %335 = vmatprep.mubr.bf16.mxu0 %v1511_v2 }
  0x24   :  { %305 = vmatprep.subr.bf16.mxu0 %v1556_v4  ;;  %1242 = vmatmul.mubr.bf16.vlgmr.msra.gmra.mrb[0].mxu1 %v58_v25  ;;  %v388_v25 = vunpack.c.h.bf16 %v1118_v61 }
  0x25   :  { %1246 = vmatpush3.bf16.msra.mxu1 %v1585_v9  ;;  %1261 = vmatprep.mubr.msk.bf16.mxu1 %vm1512_vm0, %v1510_v1 }
  0x26   :  { %1247 = vmatprep.subr.bf16.mxu1 %v1510_v1 }
  0x27   :  { %306 = vmatpush1.bf16.msra.mxu0 %v1562_v5 }
  0x28   :  { %307 = vmatprep.subr.bf16.mxu0 %v1568_v6 }
  0x29   :  { %1248 = vmatpush3.bf16.msra.mxu1 %v1604_v12 }
  0x2a   :  { %1249 = vmatprep.subr.bf16.mxu1 %v1510_v1 }
  0x2b   :  { %308 = vmatpush1.bf16.msra.mxu0 %v1574_v7 }
  0x2c   :  { %309 = vmatprep.subr.bf16.mxu0 %v1580_v8 }
  0x2d   :  { %1250 = vmatpush3.bf16.msra.mxu1 %v1616_v14 }
  0x2e   :  { %1251 = vmatprep.subr.bf16.mxu1 %v1510_v1 }
  0x2f   :  { %310 = vmatpush1.bf16.msra.mxu0 %v1591_v10 }
  0x30   :  { %311 = vmatprep.subr.bf16.mxu0 %v1598_v11 }
  0x31   :  { %1252 = vmatpush3.bf16.msra.mxu1 %v1635_v17 }
  0x32   :  { %1253 = vmatprep.subr.bf16.mxu1 %v1510_v1 }
  0x33   :  { %312 = vmatpush1.bf16.msra.mxu0 %v1609_v13 }
  0x34   :  { %313 = vmatprep.subr.bf16.mxu0 %v1622_v15 }
  0x35   :  { %1254 = vmatpush3.bf16.msra.mxu1 %v1654_v20 }
  0x36   :  { %1255 = vmatprep.subr.bf16.mxu1 %v1510_v1 }
  0x37   :  { %314 = vmatpush1.bf16.msra.mxu0 %v1629_v16 }
  0x38   :  { %315 = vmatprep.subr.bf16.mxu0 %v1641_v18 }
  0x39   :  { %1256 = vmatpush3.bf16.msra.mxu1 %v1678_v24 }
  0x3a   :  { %1257 = vmatprep.subr.bf16.mxu1 %v1510_v1 }
  0x3b   :  { %316 = vmatpush1.bf16.msra.mxu0 %v1648_v19 }
  0x3c   :  { %317 = vmatprep.subr.bf16.mxu0 %v1660_v21 }
  0x3d   :  { %1258 = vmatpush3.bf16.msra.mxu1 %v1689_v26 }
  0x3e   :  { %1259 = vmatprep.subr.bf16.mxu1 %v1510_v1 }
  0x3f   :  { %318 = vmatpush1.bf16.msra.mxu0 %v1667_v22 }
  0x40   :  { %415 = vmatprep.subr.bf16.mxu0 %v1541_v0 }
  0x41   :  { %1260 = vmatpush3.bf16.msra.mxu1 %v1697_v27 }
  0x42   :  { %1265 = vmatprep.subr.bf16.mxu1 %v1510_v1 }
  0xf5   :  { %v221_v30 = vpop.f32.mrb[0].mxu0 }
  0xf6   :  { %v273_v32 = vadd.f32 %v270_v29, %v221_v30  ;;  %v223_v33 = vpop.f32.mrb[1].mxu0 }
  0xf7   :  { %v225_v34 = vpop.f32.mrb[2].mxu0  ;;  %v280_v37 = vadd.f32 %v271_v31, %v223_v33  ;;  %v262_v39 = vpop.f32.mrb[0].mxu1 }
  0xf8   :  { %v1115_v35 = vmul.f32 -1.442695, %v273_v32  ;;  %v226_v36 = vpop.f32.mrb[3].mxu0  ;;  %v1243_v40 = vpop.f32.mrb[1].mxu1  ;;  %v293_v49 = vadd.f32 %v1743_v46, %v262_v39 }
  0xf9   :  { %v1116_v38 = vmul.f32 -1.442695, %v280_v37  ;;  %v265_v41 = vpop.f32.mrb[2].mxu1 }
  0xfa   :  { %1420 = vpow2.f32 %v1115_v35  ;;  %v1244_v42 = vpop.f32.mrb[3].mxu1  ;;  %v1799_v41 = vld [vmem:[%s2092_s0 + $0x14] ss:$12 sps:$4 sm:$0xff]  }
  0xfb   :  { %1422 = vpow2.f32 %v1116_v38 }
 0x104   :  { %v1421_v43 = vpop.eup %1420 }
 0x105   :  { %v277_v44 = vadd.f32 1.0, %v1421_v43  ;;  %v1423_v45 = vpop.eup %1422  ;;  %v389_v43 = vunpack.c.l.bf16 %v1799_v41 }
 0x106   :  { %v284_v48 = vadd.f32 1.0, %v1423_v45 }
 0x107   :  { %1424 = vrcp.f32 %v277_v44 }
 0x108   :  { %1426 = vrcp.f32 %v284_v48 }
 0x111   :  { %v1425_v51 = vpop.eup %1424 }
 0x112   :  { %v294_v52 = vmul.f32 %v1425_v51, %v293_v49  ;;  %v1427_v54 = vpop.eup %1426 }
 0x113   :  { %v297_v55 = vsub.f32 1.0, %v1427_v54  ;;  %v299_v58 = vmul.f32 %v1427_v54, %v1672_v23 }
 0x114   :  { %v295_v53 = vadd.f32 %v294_v52, %v272_v50 }
 0x116   :  { %1428 = vtanh.f32 %v295_v53 }
 0x120   :  { %v1429_v56 = vpop.eup %1428 }
 0x121   :  { %v298_v57 = vmul.f32 %v1429_v56, %v297_v55  ;;  %v1123_v56 = vld [vmem:[%s2092_s0 + $0x18] sm:$0xff] }
 0x123   :  { %v1750_v59 = vadd.f32 %v299_v58, %v298_v57  ;;  %v499_v57 = vunpack.c.l.bf16 %v1123_v56 }
 0x125   :  { %301 = vst [vmem:[%s2094_s4] sm:$0xff] %v1750_v59  ;;  %v302_v60 = vpack.c.bf16 %v1750_v59, %v1750_v59 }
 0x127   :  { %336 = vmatmul.mubr.bf16.vlgmr.msra.gmra.mrb[4].mxu0 %v302_v60  ;;  %1262 = vmatmul.mubr.bf16.vlgmr.msra.gmra.mrb[4].mxu1 %v302_v60  ;;  %v500_v60 = vunpack.c.h.bf16 %v1123_v56 }
 0x128   :  { %416 = vmatpush1.bf16.msra.mxu0 %v1548_v3  ;;  %1266 = vmatpush3.bf16.msra.mxu1 %v1585_v9 }
 0x129   :  { %417 = vmatprep.subr.bf16.mxu0 %v1556_v4  ;;  %1267 = vmatprep.subr.bf16.mxu1 %v1510_v1 }
 0x12a   :  { %447 = vmatprep.mubr.bf16.mxu0 %v1511_v2  ;;  %1281 = vmatprep.mubr.msk.bf16.mxu1 %vm1512_vm0, %v1510_v1 }
 0x12c   :  { %418 = vmatpush1.bf16.msra.mxu0 %v1562_v5  ;;  %1268 = vmatpush3.bf16.msra.mxu1 %v1604_v12 }
 0x12d   :  { %419 = vmatprep.subr.bf16.mxu0 %v1568_v6  ;;  %1269 = vmatprep.subr.bf16.mxu1 %v1510_v1 }
 0x130   :  { %420 = vmatpush1.bf16.msra.mxu0 %v1574_v7  ;;  %1270 = vmatpush3.bf16.msra.mxu1 %v1616_v14 }
 0x131   :  { %421 = vmatprep.subr.bf16.mxu0 %v1580_v8  ;;  %1271 = vmatprep.subr.bf16.mxu1 %v1510_v1 }
 0x134   :  { %422 = vmatpush1.bf16.msra.mxu0 %v1591_v10  ;;  %1272 = vmatpush3.bf16.msra.mxu1 %v1635_v17 }
 0x135   :  { %423 = vmatprep.subr.bf16.mxu0 %v1598_v11  ;;  %1273 = vmatprep.subr.bf16.mxu1 %v1510_v1 }
 0x138   :  { %424 = vmatpush1.bf16.msra.mxu0 %v1609_v13  ;;  %1274 = vmatpush3.bf16.msra.mxu1 %v1654_v20 }
 0x139   :  { %425 = vmatprep.subr.bf16.mxu0 %v1622_v15  ;;  %1275 = vmatprep.subr.bf16.mxu1 %v1510_v1 }
 0x13c   :  { %426 = vmatpush1.bf16.msra.mxu0 %v1629_v16  ;;  %1276 = vmatpush3.bf16.msra.mxu1 %v1678_v24 }
 0x13d   :  { %427 = vmatprep.subr.bf16.mxu0 %v1641_v18  ;;  %1277 = vmatprep.subr.bf16.mxu1 %v1510_v1 }
 0x140   :  { %428 = vmatpush1.bf16.msra.mxu0 %v1648_v19  ;;  %1278 = vmatpush3.bf16.msra.mxu1 %v1689_v26 }
 0x141   :  { %429 = vmatprep.subr.bf16.mxu0 %v1660_v21  ;;  %1279 = vmatprep.subr.bf16.mxu1 %v1510_v1 }
 0x144   :  { %430 = vmatpush1.bf16.msra.mxu0 %v1667_v22  ;;  %1280 = vmatpush3.bf16.msra.mxu1 %v1697_v27 }
 0x145   :  { %527 = vmatprep.subr.bf16.mxu0 %v1541_v0  ;;  %1285 = vmatprep.subr.bf16.mxu1 %v1510_v1 }
 0x1fa   :  { %v337_v63 = vpop.f32.mrb[4].mxu0  ;;  %v378_v23 = vpop.f32.mrb[4].mxu1 }
 0x1fb   :  { %v390_v28 = vadd.f32 %v387_v62, %v337_v63  ;;  %v339_v29 = vpop.f32.mrb[5].mxu0  ;;  %v1263_v30 = vpop.f32.mrb[5].mxu1  ;;  %v404_v44 = vadd.f32 %v1743_v46, %v378_v23 }
 0x1fc   :  { %v341_v31 = vpop.f32.mrb[6].mxu0  ;;  %v381_v32 = vpop.f32.mrb[6].mxu1  ;;  %v397_v36 = vadd.f32 %v388_v25, %v339_v29 }
 0x1fd   :  { %v1120_v33 = vmul.f32 -1.442695, %v390_v28  ;;  %v342_v34 = vpop.f32.mrb[7].mxu0  ;;  %v1264_v35 = vpop.f32.mrb[7].mxu1 }
 0x1fe   :  { %v1121_v37 = vmul.f32 -1.442695, %v397_v36 }
 0x1ff   :  { %1430 = vpow2.f32 %v1120_v33 }
 0x200   :  { %1432 = vpow2.f32 %v1121_v37  ;;  %v501_v37 = vunpack.c.h.bf16 %v1799_v41 }
 0x209   :  { %v1431_v38 = vpop.eup %1430 }
 0x20a   :  { %v394_v39 = vadd.f32 1.0, %v1431_v38  ;;  %v1433_v40 = vpop.eup %1432 }
 0x20b   :  { %v401_v42 = vadd.f32 1.0, %v1433_v40 }
 0x20c   :  { %1434 = vrcp.f32 %v394_v39 }
 0x20d   :  { %1436 = vrcp.f32 %v401_v42 }
 0x216   :  { %v1435_v45 = vpop.eup %1434 }
 0x217   :  { %v405_v47 = vmul.f32 %v1435_v45, %v404_v44  ;;  %v1437_v49 = vpop.eup %1436 }
 0x218   :  { %v408_v50 = vsub.f32 1.0, %v1437_v49  ;;  %v410_v53 = vmul.f32 %v1437_v49, %v1750_v59 }
 0x219   :  { %v406_v48 = vadd.f32 %v405_v47, %v389_v43 }
 0x21b   :  { %1438 = vtanh.f32 %v406_v48 }
 0x225   :  { %v1439_v51 = vpop.eup %1438 }
 0x226   :  { %v409_v52 = vmul.f32 %v1439_v51, %v408_v50  ;;  %v1128_v50 = vld [vmem:[%s2092_s0 + $0x24] sm:$0xff] }
 0x227   :  { %v611_v51 = vunpack.c.l.bf16 %v1128_v50 }
 0x228   :  { %v1804_v54 = vadd.f32 %v410_v53, %v409_v52 }
 0x22a   :  { %1122 = vst [vmem:[%s2094_s4 + $0x8] sm:$0xff] %v1804_v54  ;;  %v414_v55 = vpack.c.bf16 %v1804_v54, %v1804_v54 }
 0x22c   :  { %448 = vmatmul.mubr.bf16.vlgmr.msra.gmra.mrb[8].mxu0 %v414_v55  ;;  %1282 = vmatmul.mubr.bf16.vlgmr.msra.gmra.mrb[8].mxu1 %v414_v55 }
 0x22d   :  { %528 = vmatpush1.bf16.msra.mxu0 %v1548_v3  ;;  %1286 = vmatpush3.bf16.msra.mxu1 %v1585_v9 }
 0x22e   :  { %529 = vmatprep.subr.bf16.mxu0 %v1556_v4  ;;  %1287 = vmatprep.subr.bf16.mxu1 %v1510_v1 }
 0x22f   :  { %559 = vmatprep.mubr.bf16.mxu0 %v1511_v2  ;;  %1301 = vmatprep.mubr.msk.bf16.mxu1 %vm1512_vm0, %v1510_v1 }
 0x231   :  { %530 = vmatpush1.bf16.msra.mxu0 %v1562_v5  ;;  %1288 = vmatpush3.bf16.msra.mxu1 %v1604_v12 }
 0x232   :  { %531 = vmatprep.subr.bf16.mxu0 %v1568_v6  ;;  %1289 = vmatprep.subr.bf16.mxu1 %v1510_v1 }
 0x235   :  { %532 = vmatpush1.bf16.msra.mxu0 %v1574_v7  ;;  %1290 = vmatpush3.bf16.msra.mxu1 %v1616_v14 }
 0x236   :  { %533 = vmatprep.subr.bf16.mxu0 %v1580_v8  ;;  %1291 = vmatprep.subr.bf16.mxu1 %v1510_v1 }
 0x239   :  { %534 = vmatpush1.bf16.msra.mxu0 %v1591_v10  ;;  %1292 = vmatpush3.bf16.msra.mxu1 %v1635_v17 }
 0x23a   :  { %535 = vmatprep.subr.bf16.mxu0 %v1598_v11  ;;  %1293 = vmatprep.subr.bf16.mxu1 %v1510_v1 }
 0x23d   :  { %536 = vmatpush1.bf16.msra.mxu0 %v1609_v13  ;;  %1294 = vmatpush3.bf16.msra.mxu1 %v1654_v20 }
 0x23e   :  { %537 = vmatprep.subr.bf16.mxu0 %v1622_v15  ;;  %1295 = vmatprep.subr.bf16.mxu1 %v1510_v1 }
 0x241   :  { %538 = vmatpush1.bf16.msra.mxu0 %v1629_v16  ;;  %1296 = vmatpush3.bf16.msra.mxu1 %v1678_v24 }
 0x242   :  { %539 = vmatprep.subr.bf16.mxu0 %v1641_v18  ;;  %1297 = vmatprep.subr.bf16.mxu1 %v1510_v1 }
 0x245   :  { %540 = vmatpush1.bf16.msra.mxu0 %v1648_v19  ;;  %1298 = vmatpush3.bf16.msra.mxu1 %v1689_v26 }
 0x246   :  { %541 = vmatprep.subr.bf16.mxu0 %v1660_v21  ;;  %1299 = vmatprep.subr.bf16.mxu1 %v1510_v1 }
 0x249   :  { %542 = vmatpush1.bf16.msra.mxu0 %v1667_v22  ;;  %1300 = vmatpush3.bf16.msra.mxu1 %v1697_v27 }
 0x24a   :  { %639 = vmatprep.subr.bf16.mxu0 %v1541_v0  ;;  %1305 = vmatprep.subr.bf16.mxu1 %v1510_v1 }
 0x2ff   :  { %v449_v58 = vpop.f32.mrb[8].mxu0  ;;  %v490_v59 = vpop.f32.mrb[8].mxu1 }
 0x300   :  { %v502_v61 = vadd.f32 %v499_v57, %v449_v58  ;;  %v451_v62 = vpop.f32.mrb[9].mxu0  ;;  %v1283_v63 = vpop.f32.mrb[9].mxu1  ;;  %v516_v38 = vadd.f32 %v1743_v46, %v490_v59 }
 0x301   :  { %v453_v23 = vpop.f32.mrb[10].mxu0  ;;  %v493_v25 = vpop.f32.mrb[10].mxu1  ;;  %v509_v31 = vadd.f32 %v500_v60, %v451_v62 }
 0x302   :  { %v1125_v28 = vmul.f32 -1.442695, %v502_v61  ;;  %v454_v29 = vpop.f32.mrb[11].mxu0  ;;  %v1284_v30 = vpop.f32.mrb[11].mxu1 }
 0x303   :  { %v1126_v32 = vmul.f32 -1.442695, %v509_v31  ;;  %v1902_v30 = vld [vmem:[%s2092_s0 + $0x2c] ss:$12 sps:$4 sm:$0xff]  }
 0x304   :  { %1440 = vpow2.f32 %v1125_v28 }
 0x305   :  { %1442 = vpow2.f32 %v1126_v32  ;;  %v613_v32 = vunpack.c.l.bf16 %v1902_v30 }
 0x30e   :  { %v1441_v33 = vpop.eup %1440 }
 0x30f   :  { %v506_v34 = vadd.f32 1.0, %v1441_v33  ;;  %v1443_v35 = vpop.eup %1442 }
 0x310   :  { %v513_v36 = vadd.f32 1.0, %v1443_v35 }
 0x311   :  { %1444 = vrcp.f32 %v506_v34 }
 0x312   :  { %1446 = vrcp.f32 %v513_v36 }
 0x31b   :  { %v1445_v39 = vpop.eup %1444 }
 0x31c   :  { %v517_v40 = vmul.f32 %v1445_v39, %v516_v38  ;;  %v1447_v43 = vpop.eup %1446 }
 0x31d   :  { %v520_v44 = vsub.f32 1.0, %v1447_v43  ;;  %v522_v48 = vmul.f32 %v1447_v43, %v1804_v54  ;;  %v612_v54 = vunpack.c.h.bf16 %v1128_v50 }
 0x31e   :  { %v518_v42 = vadd.f32 %v517_v40, %v501_v37 }
 0x320   :  { %1448 = vtanh.f32 %v518_v42 }
 0x32a   :  { %v1449_v45 = vpop.eup %1448 }
 0x32b   :  { %v521_v47 = vmul.f32 %v1449_v45, %v520_v44  ;;  %v1133_v45 = vld [vmem:[%s2092_s0 + $0x30] sm:$0xff] }
 0x32d   :  { %v1853_v49 = vadd.f32 %v522_v48, %v521_v47  ;;  %v723_v47 = vunpack.c.l.bf16 %v1133_v45 }
 0x32f   :  { %1127 = vst [vmem:[%s2094_s4 + $0x10] sm:$0xff] %v1853_v49  ;;  %v526_v41 = vpack.c.bf16 %v1853_v49, %v1853_v49 }
 0x331   :  { %560 = vmatmul.mubr.bf16.vlgmr.msra.gmra.mrb[12].mxu0 %v526_v41  ;;  %1302 = vmatmul.mubr.bf16.vlgmr.msra.gmra.mrb[12].mxu1 %v526_v41  ;;  %v724_v41 = vunpack.c.h.bf16 %v1133_v45 }
 0x332   :  { %640 = vmatpush1.bf16.msra.mxu0 %v1548_v3  ;;  %1306 = vmatpush3.bf16.msra.mxu1 %v1585_v9 }
 0x333   :  { %641 = vmatprep.subr.bf16.mxu0 %v1556_v4  ;;  %1307 = vmatprep.subr.bf16.mxu1 %v1510_v1 }
 0x334   :  { %671 = vmatprep.mubr.bf16.mxu0 %v1511_v2  ;;  %1321 = vmatprep.mubr.msk.bf16.mxu1 %vm1512_vm0, %v1510_v1 }
 0x336   :  { %642 = vmatpush1.bf16.msra.mxu0 %v1562_v5  ;;  %1308 = vmatpush3.bf16.msra.mxu1 %v1604_v12 }
 0x337   :  { %643 = vmatprep.subr.bf16.mxu0 %v1568_v6  ;;  %1309 = vmatprep.subr.bf16.mxu1 %v1510_v1 }
 0x33a   :  { %644 = vmatpush1.bf16.msra.mxu0 %v1574_v7  ;;  %1310 = vmatpush3.bf16.msra.mxu1 %v1616_v14 }
 0x33b   :  { %645 = vmatprep.subr.bf16.mxu0 %v1580_v8  ;;  %1311 = vmatprep.subr.bf16.mxu1 %v1510_v1 }
 0x33e   :  { %646 = vmatpush1.bf16.msra.mxu0 %v1591_v10  ;;  %1312 = vmatpush3.bf16.msra.mxu1 %v1635_v17 }
 0x33f   :  { %647 = vmatprep.subr.bf16.mxu0 %v1598_v11  ;;  %1313 = vmatprep.subr.bf16.mxu1 %v1510_v1 }
 0x342   :  { %648 = vmatpush1.bf16.msra.mxu0 %v1609_v13  ;;  %1314 = vmatpush3.bf16.msra.mxu1 %v1654_v20 }
 0x343   :  { %649 = vmatprep.subr.bf16.mxu0 %v1622_v15  ;;  %1315 = vmatprep.subr.bf16.mxu1 %v1510_v1 }
 0x346   :  { %650 = vmatpush1.bf16.msra.mxu0 %v1629_v16  ;;  %1316 = vmatpush3.bf16.msra.mxu1 %v1678_v24 }
 0x347   :  { %651 = vmatprep.subr.bf16.mxu0 %v1641_v18  ;;  %1317 = vmatprep.subr.bf16.mxu1 %v1510_v1 }
 0x34a   :  { %652 = vmatpush1.bf16.msra.mxu0 %v1648_v19  ;;  %1318 = vmatpush3.bf16.msra.mxu1 %v1689_v26 }
 0x34b   :  { %653 = vmatprep.subr.bf16.mxu0 %v1660_v21  ;;  %1319 = vmatprep.subr.bf16.mxu1 %v1510_v1 }
 0x34e   :  { %654 = vmatpush1.bf16.msra.mxu0 %v1667_v22  ;;  %1320 = vmatpush3.bf16.msra.mxu1 %v1697_v27 }
 0x34f   :  { %751 = vmatprep.subr.bf16.mxu0 %v1541_v0  ;;  %1325 = vmatprep.subr.bf16.mxu1 %v1510_v1 }
 0x404   :  { %v561_v52 = vpop.f32.mrb[12].mxu0  ;;  %v602_v53 = vpop.f32.mrb[12].mxu1 }
 0x405   :  { %v614_v55 = vadd.f32 %v611_v51, %v561_v52  ;;  %v563_v56 = vpop.f32.mrb[13].mxu0  ;;  %v1303_v57 = vpop.f32.mrb[13].mxu1  ;;  %v628_v33 = vadd.f32 %v1743_v46, %v602_v53 }
 0x406   :  { %v565_v58 = vpop.f32.mrb[14].mxu0  ;;  %v605_v59 = vpop.f32.mrb[14].mxu1  ;;  %v621_v63 = vadd.f32 %v612_v54, %v563_v56 }
 0x407   :  { %v1130_v60 = vmul.f32 -1.442695, %v614_v55  ;;  %v566_v61 = vpop.f32.mrb[15].mxu0  ;;  %v1304_v62 = vpop.f32.mrb[15].mxu1 }
 0x408   :  { %v1131_v23 = vmul.f32 -1.442695, %v621_v63 }
 0x409   :  { %1450 = vpow2.f32 %v1130_v60 }
 0x40a   :  { %1452 = vpow2.f32 %v1131_v23  ;;  %v725_v23 = vunpack.c.h.bf16 %v1902_v30 }
 0x413   :  { %v1451_v25 = vpop.eup %1450 }
 0x414   :  { %v618_v28 = vadd.f32 1.0, %v1451_v25  ;;  %v1453_v29 = vpop.eup %1452 }
 0x415   :  { %v625_v31 = vadd.f32 1.0, %v1453_v29 }
 0x416   :  { %1454 = vrcp.f32 %v618_v28 }
 0x417   :  { %1456 = vrcp.f32 %v625_v31 }
 0x420   :  { %v1455_v34 = vpop.eup %1454 }
 0x421   :  { %v629_v35 = vmul.f32 %v1455_v34, %v628_v33  ;;  %v1457_v37 = vpop.eup %1456 }
 0x422   :  { %v632_v38 = vsub.f32 1.0, %v1457_v37  ;;  %v634_v42 = vmul.f32 %v1457_v37, %v1853_v49 }
 0x423   :  { %v630_v36 = vadd.f32 %v629_v35, %v613_v32 }
 0x425   :  { %1458 = vtanh.f32 %v630_v36 }
 0x42f   :  { %v1459_v39 = vpop.eup %1458 }
 0x430   :  { %v633_v40 = vmul.f32 %v1459_v39, %v632_v38 }
 0x432   :  { %v1907_v43 = vadd.f32 %v634_v42, %v633_v40 }
 0x434   :  { %1132 = vst [vmem:[%s2094_s4 + $0x18] sm:$0xff] %v1907_v43  ;;  %v638_v44 = vpack.c.bf16 %v1907_v43, %v1907_v43 }
 0x436   :  { %672 = vmatmul.mubr.bf16.vlgmr.msra.gmra.mrb[16].mxu0 %v638_v44  ;;  %1322 = vmatmul.mubr.bf16.vlgmr.msra.gmra.mrb[16].mxu1 %v638_v44 }
 0x437   :  { %752 = vmatpush1.bf16.msra.mxu0 %v1548_v3  ;;  %1326 = vmatpush3.bf16.msra.mxu1 %v1585_v9 }
 0x438   :  { %753 = vmatprep.subr.bf16.mxu0 %v1556_v4  ;;  %1327 = vmatprep.subr.bf16.mxu1 %v1510_v1 }
 0x439   :  { %783 = vmatprep.mubr.bf16.mxu0 %v1511_v2  ;;  %1341 = vmatprep.mubr.msk.bf16.mxu1 %vm1512_vm0, %v1510_v1 }
 0x43b   :  { %754 = vmatpush1.bf16.msra.mxu0 %v1562_v5  ;;  %1328 = vmatpush3.bf16.msra.mxu1 %v1604_v12 }
 0x43c   :  { %755 = vmatprep.subr.bf16.mxu0 %v1568_v6  ;;  %1329 = vmatprep.subr.bf16.mxu1 %v1510_v1 }
 0x43f   :  { %756 = vmatpush1.bf16.msra.mxu0 %v1574_v7  ;;  %1330 = vmatpush3.bf16.msra.mxu1 %v1616_v14 }
 0x440   :  { %757 = vmatprep.subr.bf16.mxu0 %v1580_v8  ;;  %1331 = vmatprep.subr.bf16.mxu1 %v1510_v1 }
 0x443   :  { %758 = vmatpush1.bf16.msra.mxu0 %v1591_v10  ;;  %1332 = vmatpush3.bf16.msra.mxu1 %v1635_v17 }
 0x444   :  { %759 = vmatprep.subr.bf16.mxu0 %v1598_v11  ;;  %1333 = vmatprep.subr.bf16.mxu1 %v1510_v1 }
 0x447   :  { %760 = vmatpush1.bf16.msra.mxu0 %v1609_v13  ;;  %1334 = vmatpush3.bf16.msra.mxu1 %v1654_v20 }
 0x448   :  { %761 = vmatprep.subr.bf16.mxu0 %v1622_v15  ;;  %1335 = vmatprep.subr.bf16.mxu1 %v1510_v1 }
 0x44b   :  { %762 = vmatpush1.bf16.msra.mxu0 %v1629_v16  ;;  %1336 = vmatpush3.bf16.msra.mxu1 %v1678_v24 }
 0x44c   :  { %763 = vmatprep.subr.bf16.mxu0 %v1641_v18  ;;  %1337 = vmatprep.subr.bf16.mxu1 %v1510_v1 }
 0x44f   :  { %764 = vmatpush1.bf16.msra.mxu0 %v1648_v19  ;;  %1338 = vmatpush3.bf16.msra.mxu1 %v1689_v26 }
 0x450   :  { %765 = vmatprep.subr.bf16.mxu0 %v1660_v21  ;;  %1339 = vmatprep.subr.bf16.mxu1 %v1510_v1 }
 0x453   :  { %766 = vmatpush1.bf16.msra.mxu0 %v1667_v22  ;;  %1340 = vmatpush3.bf16.msra.mxu1 %v1697_v27 }
 0x454   :  { %863 = vmatprep.subr.bf16.mxu0 %v1541_v0  ;;  %1345 = vmatprep.subr.bf16.mxu1 %v1510_v1 }
 0x509   :  { %v673_v48 = vpop.f32.mrb[16].mxu0  ;;  %v714_v49 = vpop.f32.mrb[16].mxu1 }
 0x50a   :  { %v726_v50 = vadd.f32 %v723_v47, %v673_v48  ;;  %v675_v51 = vpop.f32.mrb[17].mxu0  ;;  %v1323_v52 = vpop.f32.mrb[17].mxu1  ;;  %v740_v25 = vadd.f32 %v1743_v46, %v714_v49  ;;  %v2005_v47 = vld [vmem:[%s2092_s0 + $0x44] ss:$12 sps:$4 sm:$0xff]  }
 0x50b   :  { %v677_v53 = vpop.f32.mrb[18].mxu0  ;;  %v717_v54 = vpop.f32.mrb[18].mxu1  ;;  %v733_v58 = vadd.f32 %v724_v41, %v675_v51  ;;  %v837_v49 = vunpack.c.l.bf16 %v2005_v47 }
 0x50c   :  { %v1135_v55 = vmul.f32 -1.442695, %v726_v50  ;;  %v678_v56 = vpop.f32.mrb[19].mxu0  ;;  %v1324_v57 = vpop.f32.mrb[19].mxu1 }
 0x50d   :  { %v1136_v59 = vmul.f32 -1.442695, %v733_v58 }
 0x50e   :  { %1460 = vpow2.f32 %v1135_v55 }
 0x50f   :  { %1462 = vpow2.f32 %v1136_v59 }
 0x518   :  { %v1461_v60 = vpop.eup %1460 }
 0x519   :  { %v730_v61 = vadd.f32 1.0, %v1461_v60  ;;  %v1463_v62 = vpop.eup %1462  ;;  %v1500_v60 = vld [vmem:[%s2090_s2] ss:$12 sps:$4 sm:$0xff]  }
 0x51a   :  { %v737_v63 = vadd.f32 1.0, %v1463_v62  ;;  %v1502_v62 = vld [vmem:[%s2090_s2 + $0x1c] ss:$12 sps:$4 sm:$0xff]  }
 0x51b   :  { %1464 = vrcp.f32 %v730_v61  ;;  %v1501_v61 = vld [vmem:[%s2090_s2 + $0x8] ss:$12 sps:$4 sm:$0xff]  }
 0x51c   :  { %1466 = vrcp.f32 %v737_v63  ;;  %v1503_v63 = vld [vmem:[%s2090_s2 + $0x18] ss:$12 sps:$4 sm:$0xff]  }
 0x525   :  { %v1465_v28 = vpop.eup %1464 }
 0x526   :  { %v741_v29 = vmul.f32 %v1465_v28, %v740_v25  ;;  %v1467_v32 = vpop.eup %1466  ;;  %v1506_v25 = vld [vmem:[%s2090_s2 + $0x4c] ss:$12 sps:$4 sm:$0xff]   ;;  %v1508_v28 = vld [vmem:[%s2090_s2 + $0x64] ss:$12 sps:$4 sm:$0xff]  }
 0x527   :  { %v744_v33 = vsub.f32 1.0, %v1467_v32  ;;  %v746_v36 = vmul.f32 %v1467_v32, %v1907_v43 }
 0x528   :  { %v742_v31 = vadd.f32 %v741_v29, %v725_v23  ;;  %v1504_v23 = vld [vmem:[%s2090_s2 + $0x34] ss:$12 sps:$4 sm:$0xff]  }
 0x52a   :  { %1468 = vtanh.f32 %v742_v31 }
 0x534   :  { %v1469_v34 = vpop.eup %1468 }
 0x535   :  { %v745_v35 = vmul.f32 %v1469_v34, %v744_v33 }
 0x537   :  { %v1956_v37 = vadd.f32 %v746_v36, %v745_v35 }
 0x539   :  { %1137 = vst [vmem:[%s2094_s4 + $0x20] sm:$0xff] %v1956_v37  ;;  %v750_v30 = vpack.c.bf16 %v1956_v37, %v1956_v37 }
 0x53b   :  { %784 = vmatmul.mubr.bf16.vlgmr.msra.gmra.mrb[20].mxu0 %v750_v30  ;;  %1342 = vmatmul.mubr.bf16.vlgmr.msra.gmra.mrb[20].mxu1 %v750_v30 }
 0x53c   :  { %864 = vmatpush1.bf16.msra.mxu0 %v1548_v3  ;;  %1346 = vmatpush3.bf16.msra.mxu1 %v1585_v9  ;;  %v1138_v3 = vld [vmem:[%s2092_s0 + $0x3c] sm:$0xff] }
 0x53d   :  { %865 = vmatprep.subr.bf16.mxu0 %v1556_v4  ;;  %1347 = vmatprep.subr.bf16.mxu1 %v1510_v1  ;;  %v835_v4 = vunpack.c.l.bf16 %v1138_v3 }
 0x53e   :  { %895 = vmatprep.mubr.bf16.mxu0 %v1511_v2  ;;  %1361 = vmatprep.mubr.msk.bf16.mxu1 %vm1512_vm0, %v1510_v1 }
 0x540   :  { %866 = vmatpush1.bf16.msra.mxu0 %v1562_v5  ;;  %1348 = vmatpush3.bf16.msra.mxu1 %v1604_v12 }
 0x541   :  { %867 = vmatprep.subr.bf16.mxu0 %v1568_v6  ;;  %1349 = vmatprep.subr.bf16.mxu1 %v1510_v1 }
 0x544   :  { %868 = vmatpush1.bf16.msra.mxu0 %v1574_v7  ;;  %1350 = vmatpush3.bf16.msra.mxu1 %v1616_v14  ;;  %v836_v7 = vunpack.c.h.bf16 %v1138_v3 }
 0x545   :  { %869 = vmatprep.subr.bf16.mxu0 %v1580_v8  ;;  %1351 = vmatprep.subr.bf16.mxu1 %v1510_v1 }
 0x548   :  { %870 = vmatpush1.bf16.msra.mxu0 %v1591_v10  ;;  %1352 = vmatpush3.bf16.msra.mxu1 %v1635_v17 }
 0x549   :  { %871 = vmatprep.subr.bf16.mxu0 %v1598_v11  ;;  %1353 = vmatprep.subr.bf16.mxu1 %v1510_v1 }
 0x54c   :  { %872 = vmatpush1.bf16.msra.mxu0 %v1609_v13  ;;  %1354 = vmatpush3.bf16.msra.mxu1 %v1654_v20 }
 0x54d   :  { %873 = vmatprep.subr.bf16.mxu0 %v1622_v15  ;;  %1355 = vmatprep.subr.bf16.mxu1 %v1510_v1 }
 0x550   :  { %874 = vmatpush1.bf16.msra.mxu0 %v1629_v16  ;;  %1356 = vmatpush3.bf16.msra.mxu1 %v1678_v24 }
 0x551   :  { %875 = vmatprep.subr.bf16.mxu0 %v1641_v18  ;;  %1357 = vmatprep.subr.bf16.mxu1 %v1510_v1 }
 0x554   :  { %876 = vmatpush1.bf16.msra.mxu0 %v1648_v19  ;;  %1358 = vmatpush3.bf16.msra.mxu1 %v1689_v26 }
 0x555   :  { %877 = vmatprep.subr.bf16.mxu0 %v1660_v21  ;;  %1359 = vmatprep.subr.bf16.mxu1 %v1510_v1 }
 0x558   :  { %878 = vmatpush1.bf16.msra.mxu0 %v1667_v22  ;;  %1360 = vmatpush3.bf16.msra.mxu1 %v1697_v27 }
 0x559   :  { %975 = vmatprep.subr.bf16.mxu0 %v1541_v0  ;;  %1365 = vmatprep.subr.bf16.mxu1 %v1510_v1 }
 0x60e   :  { %v785_v5 = vpop.f32.mrb[20].mxu0  ;;  %v826_v6 = vpop.f32.mrb[20].mxu1 }
 0x60f   :  { %v838_v8 = vadd.f32 %v835_v4, %v785_v5  ;;  %v787_v9 = vpop.f32.mrb[21].mxu0  ;;  %v1343_v10 = vpop.f32.mrb[21].mxu1  ;;  %v852_v41 = vadd.f32 %v1743_v46, %v826_v6 }
 0x610   :  { %v789_v11 = vpop.f32.mrb[22].mxu0  ;;  %v829_v13 = vpop.f32.mrb[22].mxu1  ;;  %v845_v42 = vadd.f32 %v836_v7, %v787_v9 }
 0x611   :  { %v1140_v38 = vmul.f32 -1.442695, %v838_v8  ;;  %v790_v39 = vpop.f32.mrb[23].mxu0  ;;  %v1344_v40 = vpop.f32.mrb[23].mxu1 }
 0x612   :  { %v1141_v0 = vmul.f32 -1.442695, %v845_v42 }
 0x613   :  { %1470 = vpow2.f32 %v1140_v38  ;;  %v1148_v38 = vld [vmem:[%s2092_s0 + $0x54] sm:$0xff] }
 0x614   :  { %1472 = vpow2.f32 %v1141_v0  ;;  %v1059_v39 = vunpack.c.l.bf16 %v1148_v38  ;;  %v1060_v0 = vunpack.c.h.bf16 %v1148_v38 }
 0x61d   :  { %v1471_v43 = vpop.eup %1470 }
 0x61e   :  { %v842_v44 = vadd.f32 1.0, %v1471_v43  ;;  %v1473_v45 = vpop.eup %1472 }
 0x61f   :  { %v849_v48 = vadd.f32 1.0, %v1473_v45 }
 0x620   :  { %1474 = vrcp.f32 %v842_v44 }
 0x621   :  { %1476 = vrcp.f32 %v849_v48 }
 0x62a   :  { %v1475_v50 = vpop.eup %1474 }
 0x62b   :  { %v853_v51 = vmul.f32 %v1475_v50, %v852_v41  ;;  %v1477_v53 = vpop.eup %1476 }
 0x62c   :  { %v856_v54 = vsub.f32 1.0, %v1477_v53  ;;  %v858_v57 = vmul.f32 %v1477_v53, %v1956_v37  ;;  %v949_v37 = vunpack.c.h.bf16 %v2005_v47 }
 0x62d   :  { %v854_v52 = vadd.f32 %v853_v51, %v837_v49 }
 0x62f   :  { %1478 = vtanh.f32 %v854_v52 }
 0x639   :  { %v1479_v55 = vpop.eup %1478 }
 0x63a   :  { %v857_v56 = vmul.f32 %v1479_v55, %v856_v54 }
 0x63c   :  { %v2010_v58 = vadd.f32 %v858_v57, %v857_v56  ;;  %v1149_v56 = vld [vmem:[%s2092_s0 + $0x5c] sm:$0xf] }
 0x63e   :  { %1142 = vst [vmem:[%s2094_s4 + $0x28] sm:$0xff] %v2010_v58  ;;  %v862_v59 = vpack.c.bf16 %v2010_v58, %v2010_v58 }
 0x640   :  { %896 = vmatmul.mubr.bf16.vlgmr.msra.gmra.mrb[24].mxu0 %v862_v59  ;;  %1362 = vmatmul.mubr.bf16.vlgmr.msra.gmra.mrb[24].mxu1 %v862_v59 }
 0x641   :  { %976 = vmatpush1.bf16.msra.mxu0 %v1500_v60  ;;  %1366 = vmatpush3.bf16.msra.mxu1 %v1501_v61 }
 0x642   :  { %977 = vmatprep.subr.bf16.mxu0 %v1502_v62  ;;  %1367 = vmatprep.subr.bf16.mxu1 %v1510_v1 }
 0x643   :  { %1007 = vmatprep.mubr.bf16.mxu0 %v1511_v2  ;;  %1381 = vmatprep.mubr.msk.bf16.mxu1 %vm1512_vm0, %v1510_v1  ;;  %v1505_v2 = vld [vmem:[%s2090_s2 + $0x30] ss:$12 sps:$4 sm:$0xff]  }
 0x645   :  { %978 = vmatpush1.bf16.msra.mxu0 %v1503_v63  ;;  %1368 = vmatpush3.bf16.msra.mxu1 %v1604_v12  ;;  %v1507_v12 = vld [vmem:[%s2090_s2 + $0x48] ss:$12 sps:$4 sm:$0xff]  }
 0x646   :  { %979 = vmatprep.subr.bf16.mxu0 %v1504_v23  ;;  %1369 = vmatprep.subr.bf16.mxu1 %v1510_v1 }
 0x649   :  { %980 = vmatpush1.bf16.msra.mxu0 %v1505_v2  ;;  %1370 = vmatpush3.bf16.msra.mxu1 %v1616_v14  ;;  %v1509_v14 = vld [vmem:[%s2090_s2 + $0x60] ss:$12 sps:$4 sm:$0xff]  }
 0x64a   :  { %981 = vmatprep.subr.bf16.mxu0 %v1506_v25  ;;  %1371 = vmatprep.subr.bf16.mxu1 %v1510_v1 }
 0x64d   :  { %982 = vmatpush1.bf16.msra.mxu0 %v1507_v12  ;;  %1372 = vmatpush3.bf16.msra.mxu1 %v1635_v17 }
 0x64e   :  { %983 = vmatprep.subr.bf16.mxu0 %v1508_v28  ;;  %1373 = vmatprep.subr.bf16.mxu1 %v1510_v1 }
 0x651   :  { %984 = vmatpush1.bf16.msra.mxu0 %v1509_v14  ;;  %1374 = vmatpush3.bf16.msra.mxu1 %v1654_v20 }
 0x652   :  { %985 = vmatprep.subr.bf16.mxu0 %v1622_v15  ;;  %1375 = vmatprep.subr.bf16.mxu1 %v1510_v1  ;;  %v1143_v15 = vld [vmem:[%s2092_s0 + $0x48] sm:$0xff] }
 0x653   :  { %v948_v20 = vunpack.c.h.bf16 %v1143_v15 }
 0x655   :  { %986 = vmatpush1.bf16.msra.mxu0 %v1629_v16  ;;  %1376 = vmatpush3.bf16.msra.mxu1 %v1678_v24  ;;  %v947_v16 = vunpack.c.l.bf16 %v1143_v15 }
 0x656   :  { %987 = vmatprep.subr.bf16.mxu0 %v1641_v18  ;;  %1377 = vmatprep.subr.bf16.mxu1 %v1510_v1 }
 0x659   :  { %988 = vmatpush1.bf16.msra.mxu0 %v1648_v19  ;;  %1378 = vmatpush3.bf16.msra.mxu1 %v1689_v26 }
 0x65a   :  { %989 = vmatprep.subr.bf16.mxu0 %v1660_v21  ;;  %1379 = vmatprep.subr.bf16.mxu1 %v1510_v1 }
 0x65d   :  { %990 = vmatpush1.bf16.msra.mxu0 %v1667_v22  ;;  %1380 = vmatpush3.bf16.msra.mxu1 %v1697_v27 }
 0x713   :  { %v897_v17 = vpop.f32.mrb[24].mxu0  ;;  %v938_v18 = vpop.f32.mrb[24].mxu1 }
 0x714   :  { %v950_v24 = vadd.f32 %v947_v16, %v897_v17  ;;  %v899_v19 = vpop.f32.mrb[25].mxu0  ;;  %v1363_v29 = vpop.f32.mrb[25].mxu1  ;;  %v964_v30 = vadd.f32 %v1743_v46, %v938_v18 }
 0x715   :  { %v901_v26 = vpop.f32.mrb[26].mxu0  ;;  %v941_v31 = vpop.f32.mrb[26].mxu1  ;;  %v957_v33 = vadd.f32 %v948_v20, %v899_v19 }
 0x716   :  { %v1145_v21 = vmul.f32 -1.442695, %v950_v24  ;;  %v902_v32 = vpop.f32.mrb[27].mxu0  ;;  %v1364_v1 = vpop.f32.mrb[27].mxu1 }
 0x717   :  { %v1146_v22 = vmul.f32 -1.442695, %v957_v33 }
 0x718   :  { %1480 = vpow2.f32 %v1145_v21 }
 0x719   :  { %1482 = vpow2.f32 %v1146_v22 }
 0x722   :  { %v1481_v27 = vpop.eup %1480 }
 0x723   :  { %v954_v34 = vadd.f32 1.0, %v1481_v27  ;;  %v1483_v35 = vpop.eup %1482 }
 0x724   :  { %v961_v36 = vadd.f32 1.0, %v1483_v35 }
 0x725   :  { %1484 = vrcp.f32 %v954_v34 }
 0x726   :  { %1486 = vrcp.f32 %v961_v36 }
 0x72f   :  { %v1485_v3 = vpop.eup %1484 }
 0x730   :  { %v965_v4 = vmul.f32 %v1485_v3, %v964_v30  ;;  %v1487_v6 = vpop.eup %1486 }
 0x731   :  { %v968_v7 = vsub.f32 1.0, %v1487_v6  ;;  %v970_v10 = vmul.f32 %v1487_v6, %v2010_v58  ;;  %v1061_v58 = vunpack.c.l.bf16 %v1149_v56 }
 0x732   :  { %v966_v5 = vadd.f32 %v965_v4, %v949_v37 }
 0x734   :  { %1488 = vtanh.f32 %v966_v5 }
 0x73e   :  { %v1489_v8 = vpop.eup %1488 }
 0x73f   :  { %v969_v9 = vmul.f32 %v1489_v8, %v968_v7 }
 0x741   :  { %v971_v11 = vadd.f32 %v970_v10, %v969_v9 }
 0x743   :  { %1147 = vst [vmem:[%s2094_s4 + $0x30] sm:$0xff] %v971_v11  ;;  %v974_v13 = vpack.c.bf16 %v971_v11, %v971_v11 }
 0x745   :  { %1008 = vmatmul.mubr.bf16.vlgmr.msra.gmra.mrb[28].mxu0 %v974_v13  ;;  %1382 = vmatmul.mubr.bf16.vlgmr.msra.gmra.mrb[28].mxu1 %v974_v13 }
 0x818   :  { %v1009_v40 = vpop.f32.mrb[28].mxu0  ;;  %v1050_v42 = vpop.f32.mrb[28].mxu1 }
 0x819   :  { %v1062_v43 = vadd.f32 %v1059_v39, %v1009_v40  ;;  %v1011_v44 = vpop.f32.mrb[29].mxu0  ;;  %v1383_v45 = vpop.f32.mrb[29].mxu1  ;;  %v1076_v59 = vadd.f32 %v1743_v46, %v1050_v42 }
 0x81a   :  { %v1013_v47 = vpop.f32.mrb[30].mxu0  ;;  %v1053_v48 = vpop.f32.mrb[30].mxu1  ;;  %v1069_v51 = vadd.f32 %v1060_v0, %v1011_v44 }
 0x81b   :  { %v1150_v49 = vmul.f32 -1.442695, %v1062_v43  ;;  %v1014_v41 = vpop.f32.mrb[31].mxu0  ;;  %v1384_v50 = vpop.f32.mrb[31].mxu1 }
 0x81c   :  { %v1151_v52 = vmul.f32 -1.442695, %v1069_v51 }
 0x81d   :  { %1490 = vpow2.f32 %v1150_v49 }
 0x81e   :  { %1492 = vpow2.f32 %v1151_v52 }
 0x827   :  { %v1491_v53 = vpop.eup %1490 }
 0x828   :  { %v1066_v54 = vadd.f32 1.0, %v1491_v53  ;;  %v1493_v55 = vpop.eup %1492 }
 0x829   :  { %v1073_v57 = vadd.f32 1.0, %v1493_v55 }
 0x82a   :  { %1494 = vrcp.f32 %v1066_v54 }
 0x82b   :  { %1496 = vrcp.f32 %v1073_v57 }
 0x834   :  { %v1495_v60 = vpop.eup %1494 }
 0x835   :  { %v1077_v61 = vmul.f32 %v1495_v60, %v1076_v59  ;;  %v1497_v63 = vpop.eup %1496 }
 0x836   :  { %v1080_v23 = vsub.f32 1.0, %v1497_v63  ;;  %v1082_v12 = vmul.f32 %v1497_v63, %v971_v11 }
 0x837   :  { %v1078_v62 = vadd.f32 %v1077_v61, %v1061_v58 }
 0x839   :  { %1498 = vtanh.f32 %v1078_v62 }
 0x843   :  { %v1499_v2 = vpop.eup %1498 }
 0x844   :  { %v1081_v25 = vmul.f32 %v1499_v2, %v1080_v23 }
 0x846   :  { %v1083_v28 = vadd.f32 %v1082_v12, %v1081_v25 }
 0x848   :  { %1152 = vst [vmem:[%s2094_s4 + $0x38] sm:$0xff] %v1083_v28 }

</bundles_post_ra>
